<compile_context>
chip_gen: v7x
topology: tpu7x:2x2x1
jax: 0.10.0
libtpu: 0.0.40
codegen_flags: <defaults>
</compile_context>

<pallas_src>
import math
import jax
import jax.numpy as jnp
from jax.experimental import pallas as pl
from jax.experimental.pallas import tpu as pltpu  # noqa: F401  (kept for scaled-up streaming path)

# ---- synthetic roberta config (small) ----
B, S, H = 2, 8, 32          # batch, seq len, hidden
NH, HD = 2, 16              # heads, head dim (NH*HD == H)
I = 64                      # FFN intermediate
VOCAB = 100
NUM_LAYERS = 2
QKV = 3 * NH * HD           # fused qkv projection width (96)
T = B * S                   # flattened token count
F32 = jnp.float32


def _layernorm(x, g, b, eps=1e-5):
    mu = jnp.mean(x, axis=-1, keepdims=True)
    var = jnp.mean((x - mu) ** 2, axis=-1, keepdims=True)
    return (x - mu) * jax.lax.rsqrt(var + eps) * g + b


def _gelu(x):
    # TODO(synk): HF RoBERTa default is exact erf GELU; tanh approximation kept (EUP-friendly).
    return 0.5 * x * (1.0 + jnp.tanh(0.7978845608028654 * (x + 0.044715 * x * x * x)))


# -------------------- fused Pallas kernel --------------------

def fused_ranker_kernel(x_ref, mask_ref, labels_ref,
                        wqkv_ref, wo_ref, w1_ref, w2_ref, pk_ref,
                        wd_ref, hsm_ref,
                        logits_ref, loss_ref):
    """Full forward: all encoder layers + classification head + BCE loss, one kernel.

    x_ref      : (T, H)            token-major activations (T = B*S)
    mask_ref   : (B, 1, S)         additive attention bias
    labels_ref : (B, 1)
    wqkv_ref   : (L, H, 3*NH*HD)   [Wq/sqrt(HD) | Wk | Wv]  (scale pre-folded)
    wo_ref     : (L, NH*HD, H)
    w1_ref     : (L, H, I)
    w2_ref     : (L, I, H)
    pk_ref     : (L, 8, 3*NH*HD)   packed biases / LayerNorm params
    wd_ref     : (H, H)            classification-head dense weight
    hsm_ref    : (3, H)            packed head small params [bd ; out_proj_w ; bo]
    """
    xf = x_ref[...]                 # (T, H) — stays resident on-chip across all layers
    mask_all = mask_ref[...]        # (B, 1, S)

    for l in range(NUM_LAYERS):     # static unroll; all weights already in VMEM
        pk = pk_ref[l]                               # (8, QKV)
        bqkv = pk[0:1, :]                            # (1, QKV)
        b1   = pk[1:2, :I]                           # (1, I)
        bo   = pk[2:3, :H]
        ln1g = pk[3:4, :H]
        ln1b = pk[4:5, :H]
        b2   = pk[5:6, :H]
        ln2g = pk[6:7, :H]
        ln2b = pk[7:8, :H]

        # ---- fused Q/K/V projection: one (T,H)@(H,3*NH*HD) MXU call ----
        qkv = jnp.dot(xf, wqkv_ref[l], preferred_element_type=jnp.float32) + bqkv

        # ---- attention (tiny per-(batch, head) score/ctx matmuls, static unroll) ----
        ctx_batches = []
        for b in range(B):
            qkv_b = qkv[b * S:(b + 1) * S, :]        # (S, QKV)
            mask_b = mask_all[b]                     # (1, S)
            head_ctx = []
            for h in range(NH):
                q = qkv_b[:, h * HD:(h + 1) * HD]                              # pre-scaled
                k = qkv_b[:, NH * HD + h * HD:NH * HD + (h + 1) * HD]
                v = qkv_b[:, 2 * NH * HD + h * HD:2 * NH * HD + (h + 1) * HD]
                scores = jax.lax.dot_general(q, k, (((1,), (1,)), ((), ())),
                                             preferred_element_type=jnp.float32)
                scores = scores + mask_b
                m = jnp.max(scores, axis=-1, keepdims=True)
                p = jnp.exp(scores - m)
                denom = jnp.sum(p, axis=-1, keepdims=True)
                p = p * pl.reciprocal(denom, approx=True)      # EUP, not a VALU divide
                head_ctx.append(jnp.dot(p, v, preferred_element_type=jnp.float32))
            ctx_batches.append(jnp.concatenate(head_ctx, axis=-1))             # (S, NH*HD)
        ctx = jnp.concatenate(ctx_batches, axis=0)                             # (T, NH*HD)

        # ---- fused output projection: one (T,NH*HD)@(NH*HD,H) MXU call ----
        attn = jnp.dot(ctx, wo_ref[l], preferred_element_type=jnp.float32) + bo
        x1 = _layernorm(xf + attn, ln1g, ln1b)

        # ---- FFN ----
        hmid = _gelu(jnp.dot(x1, w1_ref[l], preferred_element_type=jnp.float32) + b1)
        ffn = jnp.dot(hmid, w2_ref[l], preferred_element_type=jnp.float32) + b2
        xf = _layernorm(x1 + ffn, ln2g, ln2b)

    # ---- classification head ([CLS] token per example) + BCEWithLogits(mean) ----
    cls = jnp.concatenate([xf[b * S:b * S + 1, :] for b in range(B)], axis=0)  # (B, H)
    hsm = hsm_ref[...]
    bd = hsm[0:1, :]
    wo_row = hsm[1:2, :]
    bo_h = hsm[2:3, 0:1]

    dense = jnp.tanh(jnp.dot(cls, wd_ref[...], preferred_element_type=jnp.float32) + bd)
    z = jnp.sum(dense * wo_row, axis=-1, keepdims=True) + bo_h                 # (B, 1)
    logits_ref[...] = z

    y = labels_ref[...]
    # numerically-stable BCE-with-logits, mean reduction
    per = jnp.maximum(z, 0.0) - z * y + jnp.log(1.0 + jnp.exp(-jnp.abs(z)))
    loss_ref[...] = jnp.mean(per, keepdims=True)


def fused_ranker_forward(x_flat, mask_bias, labels2d, params):
    # Single pallas_call, no grid: every operand fits fully in VMEM, so default
    # (whole-array) mapping is exactly what we want — no BlockSpecs / pipelining needed.
    return pl.pallas_call(
        fused_ranker_kernel,
        out_shape=(jax.ShapeDtypeStruct((B, 1), F32),
                   jax.ShapeDtypeStruct((1, 1), F32)),
    )(x_flat, mask_bias, labels2d,
      params["wqkv"], params["wo"], params["w1"], params["w2"], params["pk"],
      params["head_wd"], params["head_small"])


# -------------------- params --------------------

def init_params(key):
    ks = iter(jax.random.split(key, 64))
    std = 0.02
    scale = 1.0 / math.sqrt(HD)

    params = {
        "word_emb": jax.random.normal(next(ks), (VOCAB, H), F32) * std,
        "pos_emb":  jax.random.normal(next(ks), (S, H), F32) * std,
        "type_emb": jax.random.normal(next(ks), (1, H), F32) * std,
        "emb_ln_g": jnp.ones((1, H), F32),
        "emb_ln_b": jnp.zeros((1, H), F32),
    }

    wqkv_l, wo_l, w1_l, w2_l, pk_l = [], [], [], [], []
    for _ in range(NUM_LAYERS):
        wq = jax.random.normal(next(ks), (H, NH * HD), F32) * std
        wk = jax.random.normal(next(ks), (H, NH * HD), F32) * std
        wv = jax.random.normal(next(ks), (H, NH * HD), F32) * std
        wo = jax.random.normal(next(ks), (NH * HD, H), F32) * std
        w1 = jax.random.normal(next(ks), (H, I), F32) * std
        w2 = jax.random.normal(next(ks), (I, H), F32) * std
        bq = jnp.zeros((NH * HD,), F32)
        bk = jnp.zeros((NH * HD,), F32)
        bv = jnp.zeros((NH * HD,), F32)
        b1 = jnp.zeros((I,), F32)
        bo = jnp.zeros((H,), F32)
        b2 = jnp.zeros((H,), F32)
        ln1_g, ln1_b = jnp.ones((H,), F32), jnp.zeros((H,), F32)
        ln2_g, ln2_b = jnp.ones((H,), F32), jnp.zeros((H,), F32)

        # fold 1/sqrt(HD) into the query projection (weight + bias), fuse Q|K|V
        wqkv = jnp.concatenate([wq * scale, wk, wv], axis=1)     # (H, QKV)
        bqkv = jnp.concatenate([bq * scale, bk, bv], axis=0)     # (QKV,)

        # pack all 1-row params of the layer into a single (8, QKV) slab
        pk = jnp.zeros((8, QKV), F32)
        pk = pk.at[0, :].set(bqkv)
        pk = pk.at[1, :I].set(b1)
        pk = pk.at[2, :H].set(bo)
        pk = pk.at[3, :H].set(ln1_g)
        pk = pk.at[4, :H].set(ln1_b)
        pk = pk.at[5, :H].set(b2)
        pk = pk.at[6, :H].set(ln2_g)
        pk = pk.at[7, :H].set(ln2_b)

        wqkv_l.append(wqkv); wo_l.append(wo); w1_l.append(w1); w2_l.append(w2); pk_l.append(pk)

    params["wqkv"] = jnp.stack(wqkv_l)   # (L, H, QKV)
    params["wo"]   = jnp.stack(wo_l)     # (L, NH*HD, H)
    params["w1"]   = jnp.stack(w1_l)     # (L, H, I)
    params["w2"]   = jnp.stack(w2_l)     # (L, I, H)
    params["pk"]   = jnp.stack(pk_l)     # (L, 8, QKV)

    # classification head: dense(H,H)+tanh, out_proj(H,1); small params packed to (3, H)
    wd = jax.random.normal(next(ks), (H, H), F32) * std
    bd = jnp.zeros((H,), F32)
    wo_head = jax.random.normal(next(ks), (H,), F32) * std       # out_proj weight, row form
    hsm = jnp.zeros((3, H), F32)
    hsm = hsm.at[0, :].set(bd)
    hsm = hsm.at[1, :].set(wo_head)
    hsm = hsm.at[2, 0].set(0.0)                                  # out_proj bias
    params["head_wd"] = wd
    params["head_small"] = hsm
    return params


# -------------------- model forward (mirrors RankerModel.forward) --------------------

def ranker_forward(params, input_ids, attention_mask, labels=None):
    """res = roberta(ids, mask); if labels: loss = BCEWithLogits(logits.view(-1), labels)."""
    # ---- embeddings (glue, plain JAX) ----
    # TODO(synk): real RoBERTa offsets position ids by padding_idx+1; synthetic embeddings here.
    emb = (params["word_emb"][input_ids]
           + params["pos_emb"][None, :, :]
           + params["type_emb"][None, :, :])
    x = _layernorm(emb, params["emb_ln_g"], params["emb_ln_b"])
    x_flat = x.reshape(T, H)                                             # (B*S, H)
    mask_bias = (1.0 - attention_mask.astype(F32))[:, None, :] * -1e9    # (B, 1, S)

    if labels is None:
        labels2d = jnp.zeros((B, 1), F32)
    else:
        labels2d = labels.astype(F32).reshape(B, 1)

    # ---- everything else (encoder layers + head + loss) in one Pallas kernel ----
    logits2d, loss = fused_ranker_forward(x_flat, mask_bias, labels2d, params)

    res = {"logits": logits2d}                 # roberta-style (B, num_labels=1)
    if labels is not None:
        flat_logits = logits2d.reshape(-1)     # logits.view(-1)
        assert labels.reshape(-1).shape == flat_logits.shape
        res["loss"] = loss[0, 0]
    # TODO(synk): config.print_logits printing path omitted (pure python side effect).
    return res


if __name__ == "__main__":
    key = jax.random.PRNGKey(0)
    pkey, ikey = jax.random.split(key)
    params = init_params(pkey)

    input_ids = jax.random.randint(ikey, (B, S), 0, VOCAB, dtype=jnp.int32)
    attention_mask = jnp.ones((B, S), jnp.int32).at[1, 6:].set(0)   # pad last 2 toks of ex 1
    labels = jnp.array([1.0, 0.0], F32)

    res = ranker_forward(params, input_ids, attention_mask, labels)
    jax.block_until_ready(res["logits"])
    jax.block_until_ready(res["loss"])
    print("KERNEL_OK")
</pallas_src>

<mosaic_0001>
module attributes {stable_mosaic.version = 11 : i64} {
  func.func @fused_ranker_kernel(%arg0: memref<16x32xf32, #tpu.memory_space<vmem>>, %arg1: memref<2x1x8xf32, #tpu.memory_space<vmem>>, %arg2: memref<2x1xf32, #tpu.memory_space<vmem>>, %arg3: memref<2x32x96xf32, #tpu.memory_space<vmem>>, %arg4: memref<2x32x32xf32, #tpu.memory_space<vmem>>, %arg5: memref<2x32x64xf32, #tpu.memory_space<vmem>>, %arg6: memref<2x64x32xf32, #tpu.memory_space<vmem>>, %arg7: memref<2x8x96xf32, #tpu.memory_space<vmem>>, %arg8: memref<32x32xf32, #tpu.memory_space<vmem>>, %arg9: memref<3x32xf32, #tpu.memory_space<vmem>>, %arg10: memref<2x1xf32, #tpu.memory_space<vmem>>, %arg11: memref<1x1xf32, #tpu.memory_space<vmem>>) attributes {dimension_semantics = [], scalar_prefetch = 0 : i64, scratch_operands = 0 : i64, tpu.core_type = #tpu.core_type<tc>} {
    %c0 = arith.constant 0 : index
    %c0_0 = arith.constant 0 : index
    %0 = vector.load %arg0[%c0, %c0_0] : memref<16x32xf32, #tpu.memory_space<vmem>>, vector<16x32xf32>
    %c0_1 = arith.constant 0 : index
    %c0_2 = arith.constant 0 : index
    %c0_3 = arith.constant 0 : index
    %1 = vector.load %arg1[%c0_1, %c0_2, %c0_3] : memref<2x1x8xf32, #tpu.memory_space<vmem>>, vector<2x1x8xf32>
    %c0_4 = arith.constant 0 : index
    %c0_5 = arith.constant 0 : index
    %c0_6 = arith.constant 0 : index
    %2 = vector.load %arg7[%c0_4, %c0_5, %c0_6] : memref<2x8x96xf32, #tpu.memory_space<vmem>>, vector<1x8x96xf32>
    %3 = vector.shape_cast %2 : vector<1x8x96xf32> to vector<8x96xf32>
    %4 = vector.extract_strided_slice %3 {offsets = [0, 0], sizes = [1, 96], strides = [1, 1]} : vector<8x96xf32> to vector<1x96xf32>
    %5 = vector.extract_strided_slice %3 {offsets = [1, 0], sizes = [1, 64], strides = [1, 1]} : vector<8x96xf32> to vector<1x64xf32>
    %6 = vector.extract_strided_slice %3 {offsets = [2, 0], sizes = [1, 32], strides = [1, 1]} : vector<8x96xf32> to vector<1x32xf32>
    %7 = vector.extract_strided_slice %3 {offsets = [3, 0], sizes = [1, 32], strides = [1, 1]} : vector<8x96xf32> to vector<1x32xf32>
    %8 = vector.extract_strided_slice %3 {offsets = [4, 0], sizes = [1, 32], strides = [1, 1]} : vector<8x96xf32> to vector<1x32xf32>
    %9 = vector.extract_strided_slice %3 {offsets = [5, 0], sizes = [1, 32], strides = [1, 1]} : vector<8x96xf32> to vector<1x32xf32>
    %10 = vector.extract_strided_slice %3 {offsets = [6, 0], sizes = [1, 32], strides = [1, 1]} : vector<8x96xf32> to vector<1x32xf32>
    %11 = vector.extract_strided_slice %3 {offsets = [7, 0], sizes = [1, 32], strides = [1, 1]} : vector<8x96xf32> to vector<1x32xf32>
    %c0_7 = arith.constant 0 : index
    %c0_8 = arith.constant 0 : index
    %c0_9 = arith.constant 0 : index
    %12 = vector.load %arg3[%c0_7, %c0_8, %c0_9] : memref<2x32x96xf32, #tpu.memory_space<vmem>>, vector<1x32x96xf32>
    %13 = vector.shape_cast %12 : vector<1x32x96xf32> to vector<32x96xf32>
    %cst = arith.constant dense<0.000000e+00> : vector<16x96xf32>
    %14 = tpu.matmul %0, %13, %cst {dimension_numbers = #tpu.dot_dimension_numbers<[1], [0], [0], [1], [0, 0, 1, 1], [], []>} : vector<16x32xf32>, vector<32x96xf32>, vector<16x96xf32> -> vector<16x96xf32>
    %15 = vector.broadcast %4 : vector<1x96xf32> to vector<16x96xf32>
    %16 = arith.addf %14, %15 : vector<16x96xf32>
    %17 = vector.extract_strided_slice %16 {offsets = [0, 0], sizes = [8, 96], strides = [1, 1]} : vector<16x96xf32> to vector<8x96xf32>
    %18 = vector.extract_strided_slice %1 {offsets = [0, 0, 0], sizes = [1, 1, 8], strides = [1, 1, 1]} : vector<2x1x8xf32> to vector<1x1x8xf32>
    %19 = vector.shape_cast %18 : vector<1x1x8xf32> to vector<1x8xf32>
    %20 = vector.extract_strided_slice %17 {offsets = [0, 0], sizes = [8, 16], strides = [1, 1]} : vector<8x96xf32> to vector<8x16xf32>
    %21 = vector.extract_strided_slice %17 {offsets = [0, 32], sizes = [8, 16], strides = [1, 1]} : vector<8x96xf32> to vector<8x16xf32>
    %22 = vector.extract_strided_slice %17 {offsets = [0, 64], sizes = [8, 16], strides = [1, 1]} : vector<8x96xf32> to vector<8x16xf32>
    %cst_10 = arith.constant dense<0.000000e+00> : vector<8x8xf32>
    %23 = tpu.matmul %20, %21, %cst_10 {dimension_numbers = #tpu.dot_dimension_numbers<[1], [1], [0], [0], [0, 0, 1, 0], [], []>} : vector<8x16xf32>, vector<8x16xf32>, vector<8x8xf32> -> vector<8x8xf32>
    %24 = vector.broadcast %19 : vector<1x8xf32> to vector<8x8xf32>
    %25 = arith.addf %23, %24 : vector<8x8xf32>
    %cst_11 = arith.constant dense<0xFF800000> : vector<8xf32>
    %26 = vector.multi_reduction <maximumf>, %25, %cst_11 [1] : vector<8x8xf32> to vector<8xf32>
    %27 = vector.shape_cast %26 : vector<8xf32> to vector<8x1xf32>
    %28 = vector.broadcast %27 : vector<8x1xf32> to vector<8x8xf32>
    %29 = arith.subf %25, %28 : vector<8x8xf32>
    %30 = math.exp %29 : vector<8x8xf32>
    %cst_12 = arith.constant dense<0.000000e+00> : vector<8xf32>
    %31 = vector.multi_reduction <add>, %30, %cst_12 [1] : vector<8x8xf32> to vector<8xf32>
    %32 = vector.shape_cast %31 : vector<8xf32> to vector<8x1xf32>
    %33 = tpu.reciprocal %32 {approx = true} : vector<8x1xf32> -> vector<8x1xf32>
    %34 = vector.broadcast %33 : vector<8x1xf32> to vector<8x8xf32>
    %35 = arith.mulf %30, %34 : vector<8x8xf32>
    %cst_13 = arith.constant dense<0.000000e+00> : vector<8x16xf32>
    %36 = tpu.matmul %35, %22, %cst_13 {dimension_numbers = #tpu.dot_dimension_numbers<[1], [0], [0], [1], [0, 0, 1, 1], [], []>} : vector<8x8xf32>, vector<8x16xf32>, vector<8x16xf32> -> vector<8x16xf32>
    %37 = vector.extract_strided_slice %17 {offsets = [0, 16], sizes = [8, 16], strides = [1, 1]} : vector<8x96xf32> to vector<8x16xf32>
    %38 = vector.extract_strided_slice %17 {offsets = [0, 48], sizes = [8, 16], strides = [1, 1]} : vector<8x96xf32> to vector<8x16xf32>
    %39 = vector.extract_strided_slice %17 {offsets = [0, 80], sizes = [8, 16], strides = [1, 1]} : vector<8x96xf32> to vector<8x16xf32>
    %cst_14 = arith.constant dense<0.000000e+00> : vector<8x8xf32>
    %40 = tpu.matmul %37, %38, %cst_14 {dimension_numbers = #tpu.dot_dimension_numbers<[1], [1], [0], [0], [0, 0, 1, 0], [], []>} : vector<8x16xf32>, vector<8x16xf32>, vector<8x8xf32> -> vector<8x8xf32>
    %41 = vector.broadcast %19 : vector<1x8xf32> to vector<8x8xf32>
    %42 = arith.addf %40, %41 : vector<8x8xf32>
    %cst_15 = arith.constant dense<0xFF800000> : vector<8xf32>
    %43 = vector.multi_reduction <maximumf>, %42, %cst_15 [1] : vector<8x8xf32> to vector<8xf32>
    %44 = vector.shape_cast %43 : vector<8xf32> to vector<8x1xf32>
    %45 = vector.broadcast %44 : vector<8x1xf32> to vector<8x8xf32>
    %46 = arith.subf %42, %45 : vector<8x8xf32>
    %47 = math.exp %46 : vector<8x8xf32>
    %cst_16 = arith.constant dense<0.000000e+00> : vector<8xf32>
    %48 = vector.multi_reduction <add>, %47, %cst_16 [1] : vector<8x8xf32> to vector<8xf32>
    %49 = vector.shape_cast %48 : vector<8xf32> to vector<8x1xf32>
    %50 = tpu.reciprocal %49 {approx = true} : vector<8x1xf32> -> vector<8x1xf32>
    %51 = vector.broadcast %50 : vector<8x1xf32> to vector<8x8xf32>
    %52 = arith.mulf %47, %51 : vector<8x8xf32>
    %cst_17 = arith.constant dense<0.000000e+00> : vector<8x16xf32>
    %53 = tpu.matmul %52, %39, %cst_17 {dimension_numbers = #tpu.dot_dimension_numbers<[1], [0], [0], [1], [0, 0, 1, 1], [], []>} : vector<8x8xf32>, vector<8x16xf32>, vector<8x16xf32> -> vector<8x16xf32>
    %54 = tpu.concatenate %36, %53 in 1 : vector<8x16xf32>, vector<8x16xf32> -> vector<8x32xf32>
    %55 = vector.extract_strided_slice %16 {offsets = [8, 0], sizes = [8, 96], strides = [1, 1]} : vector<16x96xf32> to vector<8x96xf32>
    %56 = vector.extract_strided_slice %1 {offsets = [1, 0, 0], sizes = [1, 1, 8], strides = [1, 1, 1]} : vector<2x1x8xf32> to vector<1x1x8xf32>
    %57 = vector.shape_cast %56 : vector<1x1x8xf32> to vector<1x8xf32>
    %58 = vector.extract_strided_slice %55 {offsets = [0, 0], sizes = [8, 16], strides = [1, 1]} : vector<8x96xf32> to vector<8x16xf32>
    %59 = vector.extract_strided_slice %55 {offsets = [0, 32], sizes = [8, 16], strides = [1, 1]} : vector<8x96xf32> to vector<8x16xf32>
    %60 = vector.extract_strided_slice %55 {offsets = [0, 64], sizes = [8, 16], strides = [1, 1]} : vector<8x96xf32> to vector<8x16xf32>
    %cst_18 = arith.constant dense<0.000000e+00> : vector<8x8xf32>
    %61 = tpu.matmul %58, %59, %cst_18 {dimension_numbers = #tpu.dot_dimension_numbers<[1], [1], [0], [0], [0, 0, 1, 0], [], []>} : vector<8x16xf32>, vector<8x16xf32>, vector<8x8xf32> -> vector<8x8xf32>
    %62 = vector.broadcast %57 : vector<1x8xf32> to vector<8x8xf32>
    %63 = arith.addf %61, %62 : vector<8x8xf32>
    %cst_19 = arith.constant dense<0xFF800000> : vector<8xf32>
    %64 = vector.multi_reduction <maximumf>, %63, %cst_19 [1] : vector<8x8xf32> to vector<8xf32>
    %65 = vector.shape_cast %64 : vector<8xf32> to vector<8x1xf32>
    %66 = vector.broadcast %65 : vector<8x1xf32> to vector<8x8xf32>
    %67 = arith.subf %63, %66 : vector<8x8xf32>
    %68 = math.exp %67 : vector<8x8xf32>
    %cst_20 = arith.constant dense<0.000000e+00> : vector<8xf32>
    %69 = vector.multi_reduction <add>, %68, %cst_20 [1] : vector<8x8xf32> to vector<8xf32>
    %70 = vector.shape_cast %69 : vector<8xf32> to vector<8x1xf32>
    %71 = tpu.reciprocal %70 {approx = true} : vector<8x1xf32> -> vector<8x1xf32>
    %72 = vector.broadcast %71 : vector<8x1xf32> to vector<8x8xf32>
    %73 = arith.mulf %68, %72 : vector<8x8xf32>
    %cst_21 = arith.constant dense<0.000000e+00> : vector<8x16xf32>
    %74 = tpu.matmul %73, %60, %cst_21 {dimension_numbers = #tpu.dot_dimension_numbers<[1], [0], [0], [1], [0, 0, 1, 1], [], []>} : vector<8x8xf32>, vector<8x16xf32>, vector<8x16xf32> -> vector<8x16xf32>
    %75 = vector.extract_strided_slice %55 {offsets = [0, 16], sizes = [8, 16], strides = [1, 1]} : vector<8x96xf32> to vector<8x16xf32>
    %76 = vector.extract_strided_slice %55 {offsets = [0, 48], sizes = [8, 16], strides = [1, 1]} : vector<8x96xf32> to vector<8x16xf32>
    %77 = vector.extract_strided_slice %55 {offsets = [0, 80], sizes = [8, 16], strides = [1, 1]} : vector<8x96xf32> to vector<8x16xf32>
    %cst_22 = arith.constant dense<0.000000e+00> : vector<8x8xf32>
    %78 = tpu.matmul %75, %76, %cst_22 {dimension_numbers = #tpu.dot_dimension_numbers<[1], [1], [0], [0], [0, 0, 1, 0], [], []>} : vector<8x16xf32>, vector<8x16xf32>, vector<8x8xf32> -> vector<8x8xf32>
    %79 = vector.broadcast %57 : vector<1x8xf32> to vector<8x8xf32>
    %80 = arith.addf %78, %79 : vector<8x8xf32>
    %cst_23 = arith.constant dense<0xFF800000> : vector<8xf32>
    %81 = vector.multi_reduction <maximumf>, %80, %cst_23 [1] : vector<8x8xf32> to vector<8xf32>
    %82 = vector.shape_cast %81 : vector<8xf32> to vector<8x1xf32>
    %83 = vector.broadcast %82 : vector<8x1xf32> to vector<8x8xf32>
    %84 = arith.subf %80, %83 : vector<8x8xf32>
    %85 = math.exp %84 : vector<8x8xf32>
    %cst_24 = arith.constant dense<0.000000e+00> : vector<8xf32>
    %86 = vector.multi_reduction <add>, %85, %cst_24 [1] : vector<8x8xf32> to vector<8xf32>
    %87 = vector.shape_cast %86 : vector<8xf32> to vector<8x1xf32>
    %88 = tpu.reciprocal %87 {approx = true} : vector<8x1xf32> -> vector<8x1xf32>
    %89 = vector.broadcast %88 : vector<8x1xf32> to vector<8x8xf32>
    %90 = arith.mulf %85, %89 : vector<8x8xf32>
    %cst_25 = arith.constant dense<0.000000e+00> : vector<8x16xf32>
    %91 = tpu.matmul %90, %77, %cst_25 {dimension_numbers = #tpu.dot_dimension_numbers<[1], [0], [0], [1], [0, 0, 1, 1], [], []>} : vector<8x8xf32>, vector<8x16xf32>, vector<8x16xf32> -> vector<8x16xf32>
    %92 = tpu.concatenate %74, %91 in 1 : vector<8x16xf32>, vector<8x16xf32> -> vector<8x32xf32>
    %93 = tpu.concatenate %54, %92 in 0 : vector<8x32xf32>, vector<8x32xf32> -> vector<16x32xf32>
    %c0_26 = arith.constant 0 : index
    %c0_27 = arith.constant 0 : index
    %c0_28 = arith.constant 0 : index
    %94 = vector.load %arg4[%c0_26, %c0_27, %c0_28] : memref<2x32x32xf32, #tpu.memory_space<vmem>>, vector<1x32x32xf32>
    %95 = vector.shape_cast %94 : vector<1x32x32xf32> to vector<32x32xf32>
    %cst_29 = arith.constant dense<0.000000e+00> : vector<16x32xf32>
    %96 = tpu.matmul %93, %95, %cst_29 {dimension_numbers = #tpu.dot_dimension_numbers<[1], [0], [0], [1], [0, 0, 1, 1], [], []>} : vector<16x32xf32>, vector<32x32xf32>, vector<16x32xf32> -> vector<16x32xf32>
    %97 = vector.broadcast %6 : vector<1x32xf32> to vector<16x32xf32>
    %98 = arith.addf %96, %97 : vector<16x32xf32>
    %99 = arith.addf %0, %98 : vector<16x32xf32>
    %cst_30 = arith.constant dense<0.000000e+00> : vector<16xf32>
    %100 = vector.multi_reduction <add>, %99, %cst_30 [1] : vector<16x32xf32> to vector<16xf32>
    %101 = vector.shape_cast %100 : vector<16xf32> to vector<16x1xf32>
    %cst_31 = arith.constant 3.200000e+01 : f32
    %102 = vector.broadcast %cst_31 : f32 to vector<16x1xf32>
    %103 = arith.divf %101, %102 : vector<16x1xf32>
    %104 = vector.broadcast %103 : vector<16x1xf32> to vector<16x32xf32>
    %105 = arith.subf %99, %104 : vector<16x32xf32>
    %106 = arith.mulf %105, %105 : vector<16x32xf32>
    %cst_32 = arith.constant dense<0.000000e+00> : vector<16xf32>
    %107 = vector.multi_reduction <add>, %106, %cst_32 [1] : vector<16x32xf32> to vector<16xf32>
    %108 = vector.shape_cast %107 : vector<16xf32> to vector<16x1xf32>
    %cst_33 = arith.constant 3.200000e+01 : f32
    %109 = vector.broadcast %cst_33 : f32 to vector<16x1xf32>
    %110 = arith.divf %108, %109 : vector<16x1xf32>
    %111 = vector.broadcast %103 : vector<16x1xf32> to vector<16x32xf32>
    %112 = arith.subf %99, %111 : vector<16x32xf32>
    %cst_34 = arith.constant 9.99999974E-6 : f32
    %113 = vector.broadcast %cst_34 : f32 to vector<16x1xf32>
    %114 = arith.addf %110, %113 : vector<16x1xf32>
    %115 = math.rsqrt %114 : vector<16x1xf32>
    %116 = vector.broadcast %115 : vector<16x1xf32> to vector<16x32xf32>
    %117 = arith.mulf %112, %116 : vector<16x32xf32>
    %118 = vector.broadcast %7 : vector<1x32xf32> to vector<16x32xf32>
    %119 = arith.mulf %117, %118 : vector<16x32xf32>
    %120 = vector.broadcast %8 : vector<1x32xf32> to vector<16x32xf32>
    %121 = arith.addf %119, %120 : vector<16x32xf32>
    %c0_35 = arith.constant 0 : index
    %c0_36 = arith.constant 0 : index
    %c0_37 = arith.constant 0 : index
    %122 = vector.load %arg5[%c0_35, %c0_36, %c0_37] : memref<2x32x64xf32, #tpu.memory_space<vmem>>, vector<1x32x64xf32>
    %123 = vector.shape_cast %122 : vector<1x32x64xf32> to vector<32x64xf32>
    %cst_38 = arith.constant dense<0.000000e+00> : vector<16x64xf32>
    %124 = tpu.matmul %121, %123, %cst_38 {dimension_numbers = #tpu.dot_dimension_numbers<[1], [0], [0], [1], [0, 0, 1, 1], [], []>} : vector<16x32xf32>, vector<32x64xf32>, vector<16x64xf32> -> vector<16x64xf32>
    %125 = vector.broadcast %5 : vector<1x64xf32> to vector<16x64xf32>
    %126 = arith.addf %124, %125 : vector<16x64xf32>
    %cst_39 = arith.constant 5.000000e-01 : f32
    %127 = vector.broadcast %cst_39 : f32 to vector<16x64xf32>
    %128 = arith.mulf %127, %126 : vector<16x64xf32>
    %cst_40 = arith.constant 4.471500e-02 : f32
    %129 = vector.broadcast %cst_40 : f32 to vector<16x64xf32>
    %130 = arith.mulf %129, %126 : vector<16x64xf32>
    %131 = arith.mulf %130, %126 : vector<16x64xf32>
    %132 = arith.mulf %131, %126 : vector<16x64xf32>
    %133 = arith.addf %126, %132 : vector<16x64xf32>
    %cst_41 = arith.constant 0.797884583 : f32
    %134 = vector.broadcast %cst_41 : f32 to vector<16x64xf32>
    %135 = arith.mulf %134, %133 : vector<16x64xf32>
    %136 = math.tanh %135 : vector<16x64xf32>
    %cst_42 = arith.constant 1.000000e+00 : f32
    %137 = vector.broadcast %cst_42 : f32 to vector<16x64xf32>
    %138 = arith.addf %137, %136 : vector<16x64xf32>
    %139 = arith.mulf %128, %138 : vector<16x64xf32>
    %c0_43 = arith.constant 0 : index
    %c0_44 = arith.constant 0 : index
    %c0_45 = arith.constant 0 : index
    %140 = vector.load %arg6[%c0_43, %c0_44, %c0_45] : memref<2x64x32xf32, #tpu.memory_space<vmem>>, vector<1x64x32xf32>
    %141 = vector.shape_cast %140 : vector<1x64x32xf32> to vector<64x32xf32>
    %cst_46 = arith.constant dense<0.000000e+00> : vector<16x32xf32>
    %142 = tpu.matmul %139, %141, %cst_46 {dimension_numbers = #tpu.dot_dimension_numbers<[1], [0], [0], [1], [0, 0, 1, 1], [], []>} : vector<16x64xf32>, vector<64x32xf32>, vector<16x32xf32> -> vector<16x32xf32>
    %143 = vector.broadcast %9 : vector<1x32xf32> to vector<16x32xf32>
    %144 = arith.addf %142, %143 : vector<16x32xf32>
    %145 = arith.addf %121, %144 : vector<16x32xf32>
    %cst_47 = arith.constant dense<0.000000e+00> : vector<16xf32>
    %146 = vector.multi_reduction <add>, %145, %cst_47 [1] : vector<16x32xf32> to vector<16xf32>
    %147 = vector.shape_cast %146 : vector<16xf32> to vector<16x1xf32>
    %cst_48 = arith.constant 3.200000e+01 : f32
    %148 = vector.broadcast %cst_48 : f32 to vector<16x1xf32>
    %149 = arith.divf %147, %148 : vector<16x1xf32>
    %150 = vector.broadcast %149 : vector<16x1xf32> to vector<16x32xf32>
    %151 = arith.subf %145, %150 : vector<16x32xf32>
    %152 = arith.mulf %151, %151 : vector<16x32xf32>
    %cst_49 = arith.constant dense<0.000000e+00> : vector<16xf32>
    %153 = vector.multi_reduction <add>, %152, %cst_49 [1] : vector<16x32xf32> to vector<16xf32>
    %154 = vector.shape_cast %153 : vector<16xf32> to vector<16x1xf32>
    %cst_50 = arith.constant 3.200000e+01 : f32
    %155 = vector.broadcast %cst_50 : f32 to vector<16x1xf32>
    %156 = arith.divf %154, %155 : vector<16x1xf32>
    %157 = vector.broadcast %149 : vector<16x1xf32> to vector<16x32xf32>
    %158 = arith.subf %145, %157 : vector<16x32xf32>
    %cst_51 = arith.constant 9.99999974E-6 : f32
    %159 = vector.broadcast %cst_51 : f32 to vector<16x1xf32>
    %160 = arith.addf %156, %159 : vector<16x1xf32>
    %161 = math.rsqrt %160 : vector<16x1xf32>
    %162 = vector.broadcast %161 : vector<16x1xf32> to vector<16x32xf32>
    %163 = arith.mulf %158, %162 : vector<16x32xf32>
    %164 = vector.broadcast %10 : vector<1x32xf32> to vector<16x32xf32>
    %165 = arith.mulf %163, %164 : vector<16x32xf32>
    %166 = vector.broadcast %11 : vector<1x32xf32> to vector<16x32xf32>
    %167 = arith.addf %165, %166 : vector<16x32xf32>
    %c1 = arith.constant 1 : index
    %c0_52 = arith.constant 0 : index
    %c0_53 = arith.constant 0 : index
    %168 = vector.load %arg7[%c1, %c0_52, %c0_53] : memref<2x8x96xf32, #tpu.memory_space<vmem>>, vector<1x8x96xf32>
    %169 = vector.shape_cast %168 : vector<1x8x96xf32> to vector<8x96xf32>
    %170 = vector.extract_strided_slice %169 {offsets = [0, 0], sizes = [1, 96], strides = [1, 1]} : vector<8x96xf32> to vector<1x96xf32>
    %171 = vector.extract_strided_slice %169 {offsets = [1, 0], sizes = [1, 64], strides = [1, 1]} : vector<8x96xf32> to vector<1x64xf32>
    %172 = vector.extract_strided_slice %169 {offsets = [2, 0], sizes = [1, 32], strides = [1, 1]} : vector<8x96xf32> to vector<1x32xf32>
    %173 = vector.extract_strided_slice %169 {offsets = [3, 0], sizes = [1, 32], strides = [1, 1]} : vector<8x96xf32> to vector<1x32xf32>
    %174 = vector.extract_strided_slice %169 {offsets = [4, 0], sizes = [1, 32], strides = [1, 1]} : vector<8x96xf32> to vector<1x32xf32>
    %175 = vector.extract_strided_slice %169 {offsets = [5, 0], sizes = [1, 32], strides = [1, 1]} : vector<8x96xf32> to vector<1x32xf32>
    %176 = vector.extract_strided_slice %169 {offsets = [6, 0], sizes = [1, 32], strides = [1, 1]} : vector<8x96xf32> to vector<1x32xf32>
    %177 = vector.extract_strided_slice %169 {offsets = [7, 0], sizes = [1, 32], strides = [1, 1]} : vector<8x96xf32> to vector<1x32xf32>
    %c1_54 = arith.constant 1 : index
    %c0_55 = arith.constant 0 : index
    %c0_56 = arith.constant 0 : index
    %178 = vector.load %arg3[%c1_54, %c0_55, %c0_56] : memref<2x32x96xf32, #tpu.memory_space<vmem>>, vector<1x32x96xf32>
    %179 = vector.shape_cast %178 : vector<1x32x96xf32> to vector<32x96xf32>
    %cst_57 = arith.constant dense<0.000000e+00> : vector<16x96xf32>
    %180 = tpu.matmul %167, %179, %cst_57 {dimension_numbers = #tpu.dot_dimension_numbers<[1], [0], [0], [1], [0, 0, 1, 1], [], []>} : vector<16x32xf32>, vector<32x96xf32>, vector<16x96xf32> -> vector<16x96xf32>
    %181 = vector.broadcast %170 : vector<1x96xf32> to vector<16x96xf32>
    %182 = arith.addf %180, %181 : vector<16x96xf32>
    %183 = vector.extract_strided_slice %182 {offsets = [0, 0], sizes = [8, 96], strides = [1, 1]} : vector<16x96xf32> to vector<8x96xf32>
    %184 = vector.extract_strided_slice %1 {offsets = [0, 0, 0], sizes = [1, 1, 8], strides = [1, 1, 1]} : vector<2x1x8xf32> to vector<1x1x8xf32>
    %185 = vector.shape_cast %184 : vector<1x1x8xf32> to vector<1x8xf32>
    %186 = vector.extract_strided_slice %183 {offsets = [0, 0], sizes = [8, 16], strides = [1, 1]} : vector<8x96xf32> to vector<8x16xf32>
    %187 = vector.extract_strided_slice %183 {offsets = [0, 32], sizes = [8, 16], strides = [1, 1]} : vector<8x96xf32> to vector<8x16xf32>
    %188 = vector.extract_strided_slice %183 {offsets = [0, 64], sizes = [8, 16], strides = [1, 1]} : vector<8x96xf32> to vector<8x16xf32>
    %cst_58 = arith.constant dense<0.000000e+00> : vector<8x8xf32>
    %189 = tpu.matmul %186, %187, %cst_58 {dimension_numbers = #tpu.dot_dimension_numbers<[1], [1], [0], [0], [0, 0, 1, 0], [], []>} : vector<8x16xf32>, vector<8x16xf32>, vector<8x8xf32> -> vector<8x8xf32>
    %190 = vector.broadcast %185 : vector<1x8xf32> to vector<8x8xf32>
    %191 = arith.addf %189, %190 : vector<8x8xf32>
    %cst_59 = arith.constant dense<0xFF800000> : vector<8xf32>
    %192 = vector.multi_reduction <maximumf>, %191, %cst_59 [1] : vector<8x8xf32> to vector<8xf32>
    %193 = vector.shape_cast %192 : vector<8xf32> to vector<8x1xf32>
    %194 = vector.broadcast %193 : vector<8x1xf32> to vector<8x8xf32>
    %195 = arith.subf %191, %194 : vector<8x8xf32>
    %196 = math.exp %195 : vector<8x8xf32>
    %cst_60 = arith.constant dense<0.000000e+00> : vector<8xf32>
    %197 = vector.multi_reduction <add>, %196, %cst_60 [1] : vector<8x8xf32> to vector<8xf32>
    %198 = vector.shape_cast %197 : vector<8xf32> to vector<8x1xf32>
    %199 = tpu.reciprocal %198 {approx = true} : vector<8x1xf32> -> vector<8x1xf32>
    %200 = vector.broadcast %199 : vector<8x1xf32> to vector<8x8xf32>
    %201 = arith.mulf %196, %200 : vector<8x8xf32>
    %cst_61 = arith.constant dense<0.000000e+00> : vector<8x16xf32>
    %202 = tpu.matmul %201, %188, %cst_61 {dimension_numbers = #tpu.dot_dimension_numbers<[1], [0], [0], [1], [0, 0, 1, 1], [], []>} : vector<8x8xf32>, vector<8x16xf32>, vector<8x16xf32> -> vector<8x16xf32>
    %203 = vector.extract_strided_slice %183 {offsets = [0, 16], sizes = [8, 16], strides = [1, 1]} : vector<8x96xf32> to vector<8x16xf32>
    %204 = vector.extract_strided_slice %183 {offsets = [0, 48], sizes = [8, 16], strides = [1, 1]} : vector<8x96xf32> to vector<8x16xf32>
    %205 = vector.extract_strided_slice %183 {offsets = [0, 80], sizes = [8, 16], strides = [1, 1]} : vector<8x96xf32> to vector<8x16xf32>
    %cst_62 = arith.constant dense<0.000000e+00> : vector<8x8xf32>
    %206 = tpu.matmul %203, %204, %cst_62 {dimension_numbers = #tpu.dot_dimension_numbers<[1], [1], [0], [0], [0, 0, 1, 0], [], []>} : vector<8x16xf32>, vector<8x16xf32>, vector<8x8xf32> -> vector<8x8xf32>
    %207 = vector.broadcast %185 : vector<1x8xf32> to vector<8x8xf32>
    %208 = arith.addf %206, %207 : vector<8x8xf32>
    %cst_63 = arith.constant dense<0xFF800000> : vector<8xf32>
    %209 = vector.multi_reduction <maximumf>, %208, %cst_63 [1] : vector<8x8xf32> to vector<8xf32>
    %210 = vector.shape_cast %209 : vector<8xf32> to vector<8x1xf32>
    %211 = vector.broadcast %210 : vector<8x1xf32> to vector<8x8xf32>
    %212 = arith.subf %208, %211 : vector<8x8xf32>
    %213 = math.exp %212 : vector<8x8xf32>
    %cst_64 = arith.constant dense<0.000000e+00> : vector<8xf32>
    %214 = vector.multi_reduction <add>, %213, %cst_64 [1] : vector<8x8xf32> to vector<8xf32>
    %215 = vector.shape_cast %214 : vector<8xf32> to vector<8x1xf32>
    %216 = tpu.reciprocal %215 {approx = true} : vector<8x1xf32> -> vector<8x1xf32>
    %217 = vector.broadcast %216 : vector<8x1xf32> to vector<8x8xf32>
    %218 = arith.mulf %213, %217 : vector<8x8xf32>
    %cst_65 = arith.constant dense<0.000000e+00> : vector<8x16xf32>
    %219 = tpu.matmul %218, %205, %cst_65 {dimension_numbers = #tpu.dot_dimension_numbers<[1], [0], [0], [1], [0, 0, 1, 1], [], []>} : vector<8x8xf32>, vector<8x16xf32>, vector<8x16xf32> -> vector<8x16xf32>
    %220 = tpu.concatenate %202, %219 in 1 : vector<8x16xf32>, vector<8x16xf32> -> vector<8x32xf32>
    %221 = vector.extract_strided_slice %182 {offsets = [8, 0], sizes = [8, 96], strides = [1, 1]} : vector<16x96xf32> to vector<8x96xf32>
    %222 = vector.extract_strided_slice %1 {offsets = [1, 0, 0], sizes = [1, 1, 8], strides = [1, 1, 1]} : vector<2x1x8xf32> to vector<1x1x8xf32>
    %223 = vector.shape_cast %222 : vector<1x1x8xf32> to vector<1x8xf32>
    %224 = vector.extract_strided_slice %221 {offsets = [0, 0], sizes = [8, 16], strides = [1, 1]} : vector<8x96xf32> to vector<8x16xf32>
    %225 = vector.extract_strided_slice %221 {offsets = [0, 32], sizes = [8, 16], strides = [1, 1]} : vector<8x96xf32> to vector<8x16xf32>
    %226 = vector.extract_strided_slice %221 {offsets = [0, 64], sizes = [8, 16], strides = [1, 1]} : vector<8x96xf32> to vector<8x16xf32>
    %cst_66 = arith.constant dense<0.000000e+00> : vector<8x8xf32>
    %227 = tpu.matmul %224, %225, %cst_66 {dimension_numbers = #tpu.dot_dimension_numbers<[1], [1], [0], [0], [0, 0, 1, 0], [], []>} : vector<8x16xf32>, vector<8x16xf32>, vector<8x8xf32> -> vector<8x8xf32>
    %228 = vector.broadcast %223 : vector<1x8xf32> to vector<8x8xf32>
    %229 = arith.addf %227, %228 : vector<8x8xf32>
    %cst_67 = arith.constant dense<0xFF800000> : vector<8xf32>
    %230 = vector.multi_reduction <maximumf>, %229, %cst_67 [1] : vector<8x8xf32> to vector<8xf32>
    %231 = vector.shape_cast %230 : vector<8xf32> to vector<8x1xf32>
    %232 = vector.broadcast %231 : vector<8x1xf32> to vector<8x8xf32>
    %233 = arith.subf %229, %232 : vector<8x8xf32>
    %234 = math.exp %233 : vector<8x8xf32>
    %cst_68 = arith.constant dense<0.000000e+00> : vector<8xf32>
    %235 = vector.multi_reduction <add>, %234, %cst_68 [1] : vector<8x8xf32> to vector<8xf32>
    %236 = vector.shape_cast %235 : vector<8xf32> to vector<8x1xf32>
    %237 = tpu.reciprocal %236 {approx = true} : vector<8x1xf32> -> vector<8x1xf32>
    %238 = vector.broadcast %237 : vector<8x1xf32> to vector<8x8xf32>
    %239 = arith.mulf %234, %238 : vector<8x8xf32>
    %cst_69 = arith.constant dense<0.000000e+00> : vector<8x16xf32>
    %240 = tpu.matmul %239, %226, %cst_69 {dimension_numbers = #tpu.dot_dimension_numbers<[1], [0], [0], [1], [0, 0, 1, 1], [], []>} : vector<8x8xf32>, vector<8x16xf32>, vector<8x16xf32> -> vector<8x16xf32>
    %241 = vector.extract_strided_slice %221 {offsets = [0, 16], sizes = [8, 16], strides = [1, 1]} : vector<8x96xf32> to vector<8x16xf32>
    %242 = vector.extract_strided_slice %221 {offsets = [0, 48], sizes = [8, 16], strides = [1, 1]} : vector<8x96xf32> to vector<8x16xf32>
    %243 = vector.extract_strided_slice %221 {offsets = [0, 80], sizes = [8, 16], strides = [1, 1]} : vector<8x96xf32> to vector<8x16xf32>
    %cst_70 = arith.constant dense<0.000000e+00> : vector<8x8xf32>
    %244 = tpu.matmul %241, %242, %cst_70 {dimension_numbers = #tpu.dot_dimension_numbers<[1], [1], [0], [0], [0, 0, 1, 0], [], []>} : vector<8x16xf32>, vector<8x16xf32>, vector<8x8xf32> -> vector<8x8xf32>
    %245 = vector.broadcast %223 : vector<1x8xf32> to vector<8x8xf32>
    %246 = arith.addf %244, %245 : vector<8x8xf32>
    %cst_71 = arith.constant dense<0xFF800000> : vector<8xf32>
    %247 = vector.multi_reduction <maximumf>, %246, %cst_71 [1] : vector<8x8xf32> to vector<8xf32>
    %248 = vector.shape_cast %247 : vector<8xf32> to vector<8x1xf32>
    %249 = vector.broadcast %248 : vector<8x1xf32> to vector<8x8xf32>
    %250 = arith.subf %246, %249 : vector<8x8xf32>
    %251 = math.exp %250 : vector<8x8xf32>
    %cst_72 = arith.constant dense<0.000000e+00> : vector<8xf32>
    %252 = vector.multi_reduction <add>, %251, %cst_72 [1] : vector<8x8xf32> to vector<8xf32>
    %253 = vector.shape_cast %252 : vector<8xf32> to vector<8x1xf32>
    %254 = tpu.reciprocal %253 {approx = true} : vector<8x1xf32> -> vector<8x1xf32>
    %255 = vector.broadcast %254 : vector<8x1xf32> to vector<8x8xf32>
    %256 = arith.mulf %251, %255 : vector<8x8xf32>
    %cst_73 = arith.constant dense<0.000000e+00> : vector<8x16xf32>
    %257 = tpu.matmul %256, %243, %cst_73 {dimension_numbers = #tpu.dot_dimension_numbers<[1], [0], [0], [1], [0, 0, 1, 1], [], []>} : vector<8x8xf32>, vector<8x16xf32>, vector<8x16xf32> -> vector<8x16xf32>
    %258 = tpu.concatenate %240, %257 in 1 : vector<8x16xf32>, vector<8x16xf32> -> vector<8x32xf32>
    %259 = tpu.concatenate %220, %258 in 0 : vector<8x32xf32>, vector<8x32xf32> -> vector<16x32xf32>
    %c1_74 = arith.constant 1 : index
    %c0_75 = arith.constant 0 : index
    %c0_76 = arith.constant 0 : index
    %260 = vector.load %arg4[%c1_74, %c0_75, %c0_76] : memref<2x32x32xf32, #tpu.memory_space<vmem>>, vector<1x32x32xf32>
    %261 = vector.shape_cast %260 : vector<1x32x32xf32> to vector<32x32xf32>
    %cst_77 = arith.constant dense<0.000000e+00> : vector<16x32xf32>
    %262 = tpu.matmul %259, %261, %cst_77 {dimension_numbers = #tpu.dot_dimension_numbers<[1], [0], [0], [1], [0, 0, 1, 1], [], []>} : vector<16x32xf32>, vector<32x32xf32>, vector<16x32xf32> -> vector<16x32xf32>
    %263 = vector.broadcast %172 : vector<1x32xf32> to vector<16x32xf32>
    %264 = arith.addf %262, %263 : vector<16x32xf32>
    %265 = arith.addf %167, %264 : vector<16x32xf32>
    %cst_78 = arith.constant dense<0.000000e+00> : vector<16xf32>
    %266 = vector.multi_reduction <add>, %265, %cst_78 [1] : vector<16x32xf32> to vector<16xf32>
    %267 = vector.shape_cast %266 : vector<16xf32> to vector<16x1xf32>
    %cst_79 = arith.constant 3.200000e+01 : f32
    %268 = vector.broadcast %cst_79 : f32 to vector<16x1xf32>
    %269 = arith.divf %267, %268 : vector<16x1xf32>
    %270 = vector.broadcast %269 : vector<16x1xf32> to vector<16x32xf32>
    %271 = arith.subf %265, %270 : vector<16x32xf32>
    %272 = arith.mulf %271, %271 : vector<16x32xf32>
    %cst_80 = arith.constant dense<0.000000e+00> : vector<16xf32>
    %273 = vector.multi_reduction <add>, %272, %cst_80 [1] : vector<16x32xf32> to vector<16xf32>
    %274 = vector.shape_cast %273 : vector<16xf32> to vector<16x1xf32>
    %cst_81 = arith.constant 3.200000e+01 : f32
    %275 = vector.broadcast %cst_81 : f32 to vector<16x1xf32>
    %276 = arith.divf %274, %275 : vector<16x1xf32>
    %277 = vector.broadcast %269 : vector<16x1xf32> to vector<16x32xf32>
    %278 = arith.subf %265, %277 : vector<16x32xf32>
    %cst_82 = arith.constant 9.99999974E-6 : f32
    %279 = vector.broadcast %cst_82 : f32 to vector<16x1xf32>
    %280 = arith.addf %276, %279 : vector<16x1xf32>
    %281 = math.rsqrt %280 : vector<16x1xf32>
    %282 = vector.broadcast %281 : vector<16x1xf32> to vector<16x32xf32>
    %283 = arith.mulf %278, %282 : vector<16x32xf32>
    %284 = vector.broadcast %173 : vector<1x32xf32> to vector<16x32xf32>
    %285 = arith.mulf %283, %284 : vector<16x32xf32>
    %286 = vector.broadcast %174 : vector<1x32xf32> to vector<16x32xf32>
    %287 = arith.addf %285, %286 : vector<16x32xf32>
    %c1_83 = arith.constant 1 : index
    %c0_84 = arith.constant 0 : index
    %c0_85 = arith.constant 0 : index
    %288 = vector.load %arg5[%c1_83, %c0_84, %c0_85] : memref<2x32x64xf32, #tpu.memory_space<vmem>>, vector<1x32x64xf32>
    %289 = vector.shape_cast %288 : vector<1x32x64xf32> to vector<32x64xf32>
    %cst_86 = arith.constant dense<0.000000e+00> : vector<16x64xf32>
    %290 = tpu.matmul %287, %289, %cst_86 {dimension_numbers = #tpu.dot_dimension_numbers<[1], [0], [0], [1], [0, 0, 1, 1], [], []>} : vector<16x32xf32>, vector<32x64xf32>, vector<16x64xf32> -> vector<16x64xf32>
    %291 = vector.broadcast %171 : vector<1x64xf32> to vector<16x64xf32>
    %292 = arith.addf %290, %291 : vector<16x64xf32>
    %cst_87 = arith.constant 5.000000e-01 : f32
    %293 = vector.broadcast %cst_87 : f32 to vector<16x64xf32>
    %294 = arith.mulf %293, %292 : vector<16x64xf32>
    %cst_88 = arith.constant 4.471500e-02 : f32
    %295 = vector.broadcast %cst_88 : f32 to vector<16x64xf32>
    %296 = arith.mulf %295, %292 : vector<16x64xf32>
    %297 = arith.mulf %296, %292 : vector<16x64xf32>
    %298 = arith.mulf %297, %292 : vector<16x64xf32>
    %299 = arith.addf %292, %298 : vector<16x64xf32>
    %cst_89 = arith.constant 0.797884583 : f32
    %300 = vector.broadcast %cst_89 : f32 to vector<16x64xf32>
    %301 = arith.mulf %300, %299 : vector<16x64xf32>
    %302 = math.tanh %301 : vector<16x64xf32>
    %cst_90 = arith.constant 1.000000e+00 : f32
    %303 = vector.broadcast %cst_90 : f32 to vector<16x64xf32>
    %304 = arith.addf %303, %302 : vector<16x64xf32>
    %305 = arith.mulf %294, %304 : vector<16x64xf32>
    %c1_91 = arith.constant 1 : index
    %c0_92 = arith.constant 0 : index
    %c0_93 = arith.constant 0 : index
    %306 = vector.load %arg6[%c1_91, %c0_92, %c0_93] : memref<2x64x32xf32, #tpu.memory_space<vmem>>, vector<1x64x32xf32>
    %307 = vector.shape_cast %306 : vector<1x64x32xf32> to vector<64x32xf32>
    %cst_94 = arith.constant dense<0.000000e+00> : vector<16x32xf32>
    %308 = tpu.matmul %305, %307, %cst_94 {dimension_numbers = #tpu.dot_dimension_numbers<[1], [0], [0], [1], [0, 0, 1, 1], [], []>} : vector<16x64xf32>, vector<64x32xf32>, vector<16x32xf32> -> vector<16x32xf32>
    %309 = vector.broadcast %175 : vector<1x32xf32> to vector<16x32xf32>
    %310 = arith.addf %308, %309 : vector<16x32xf32>
    %311 = arith.addf %287, %310 : vector<16x32xf32>
    %cst_95 = arith.constant dense<0.000000e+00> : vector<16xf32>
    %312 = vector.multi_reduction <add>, %311, %cst_95 [1] : vector<16x32xf32> to vector<16xf32>
    %313 = vector.shape_cast %312 : vector<16xf32> to vector<16x1xf32>
    %cst_96 = arith.constant 3.200000e+01 : f32
    %314 = vector.broadcast %cst_96 : f32 to vector<16x1xf32>
    %315 = arith.divf %313, %314 : vector<16x1xf32>
    %316 = vector.broadcast %315 : vector<16x1xf32> to vector<16x32xf32>
    %317 = arith.subf %311, %316 : vector<16x32xf32>
    %318 = arith.mulf %317, %317 : vector<16x32xf32>
    %cst_97 = arith.constant dense<0.000000e+00> : vector<16xf32>
    %319 = vector.multi_reduction <add>, %318, %cst_97 [1] : vector<16x32xf32> to vector<16xf32>
    %320 = vector.shape_cast %319 : vector<16xf32> to vector<16x1xf32>
    %cst_98 = arith.constant 3.200000e+01 : f32
    %321 = vector.broadcast %cst_98 : f32 to vector<16x1xf32>
    %322 = arith.divf %320, %321 : vector<16x1xf32>
    %323 = vector.broadcast %315 : vector<16x1xf32> to vector<16x32xf32>
    %324 = arith.subf %311, %323 : vector<16x32xf32>
    %cst_99 = arith.constant 9.99999974E-6 : f32
    %325 = vector.broadcast %cst_99 : f32 to vector<16x1xf32>
    %326 = arith.addf %322, %325 : vector<16x1xf32>
    %327 = math.rsqrt %326 : vector<16x1xf32>
    %328 = vector.broadcast %327 : vector<16x1xf32> to vector<16x32xf32>
    %329 = arith.mulf %324, %328 : vector<16x32xf32>
    %330 = vector.broadcast %176 : vector<1x32xf32> to vector<16x32xf32>
    %331 = arith.mulf %329, %330 : vector<16x32xf32>
    %332 = vector.broadcast %177 : vector<1x32xf32> to vector<16x32xf32>
    %333 = arith.addf %331, %332 : vector<16x32xf32>
    %334 = vector.extract_strided_slice %333 {offsets = [0, 0], sizes = [1, 32], strides = [1, 1]} : vector<16x32xf32> to vector<1x32xf32>
    %335 = vector.extract_strided_slice %333 {offsets = [8, 0], sizes = [1, 32], strides = [1, 1]} : vector<16x32xf32> to vector<1x32xf32>
    %336 = tpu.concatenate %334, %335 in 0 : vector<1x32xf32>, vector<1x32xf32> -> vector<2x32xf32>
    %c0_100 = arith.constant 0 : index
    %c0_101 = arith.constant 0 : index
    %337 = vector.load %arg9[%c0_100, %c0_101] : memref<3x32xf32, #tpu.memory_space<vmem>>, vector<3x32xf32>
    %338 = vector.extract_strided_slice %337 {offsets = [0, 0], sizes = [1, 32], strides = [1, 1]} : vector<3x32xf32> to vector<1x32xf32>
    %339 = vector.extract_strided_slice %337 {offsets = [1, 0], sizes = [1, 32], strides = [1, 1]} : vector<3x32xf32> to vector<1x32xf32>
    %340 = vector.extract_strided_slice %337 {offsets = [2, 0], sizes = [1, 1], strides = [1, 1]} : vector<3x32xf32> to vector<1x1xf32>
    %c0_102 = arith.constant 0 : index
    %c0_103 = arith.constant 0 : index
    %341 = vector.load %arg8[%c0_102, %c0_103] : memref<32x32xf32, #tpu.memory_space<vmem>>, vector<32x32xf32>
    %cst_104 = arith.constant dense<0.000000e+00> : vector<2x32xf32>
    %342 = tpu.matmul %336, %341, %cst_104 {dimension_numbers = #tpu.dot_dimension_numbers<[1], [0], [0], [1], [0, 0, 1, 1], [], []>} : vector<2x32xf32>, vector<32x32xf32>, vector<2x32xf32> -> vector<2x32xf32>
    %343 = vector.broadcast %338 : vector<1x32xf32> to vector<2x32xf32>
    %344 = arith.addf %342, %343 : vector<2x32xf32>
    %345 = math.tanh %344 : vector<2x32xf32>
    %346 = vector.broadcast %339 : vector<1x32xf32> to vector<2x32xf32>
    %347 = arith.mulf %345, %346 : vector<2x32xf32>
    %cst_105 = arith.constant dense<0.000000e+00> : vector<2xf32>
    %348 = vector.multi_reduction <add>, %347, %cst_105 [1] : vector<2x32xf32> to vector<2xf32>
    %349 = vector.shape_cast %348 : vector<2xf32> to vector<2x1xf32>
    %350 = vector.broadcast %340 : vector<1x1xf32> to vector<2x1xf32>
    %351 = arith.addf %349, %350 : vector<2x1xf32>
    %c0_106 = arith.constant 0 : index
    %c0_107 = arith.constant 0 : index
    %352 = vector.load %arg10[%c0_106, %c0_107] : memref<2x1xf32, #tpu.memory_space<vmem>>, vector<2x1xf32>
    tpu.vector_store %arg10[%c0_106, %c0_107], %351 {strides = array<i32>} : memref<2x1xf32, #tpu.memory_space<vmem>>, vector<2x1xf32>,
    %c0_108 = arith.constant 0 : index
    %c0_109 = arith.constant 0 : index
    %353 = vector.load %arg2[%c0_108, %c0_109] : memref<2x1xf32, #tpu.memory_space<vmem>>, vector<2x1xf32>
    %cst_110 = arith.constant 0.000000e+00 : f32
    %354 = vector.broadcast %cst_110 : f32 to vector<2x1xf32>
    %355 = arith.maximumf %351, %354 : vector<2x1xf32>
    %356 = arith.mulf %351, %353 : vector<2x1xf32>
    %357 = arith.subf %355, %356 : vector<2x1xf32>
    %358 = math.absf %351 : vector<2x1xf32>
    %cst_111 = arith.constant 0.000000e+00 : f32
    %359 = vector.broadcast %cst_111 : f32 to vector<2x1xf32>
    %360 = arith.subf %359, %358 : vector<2x1xf32>
    %361 = math.exp %360 : vector<2x1xf32>
    %cst_112 = arith.constant 1.000000e+00 : f32
    %362 = vector.broadcast %cst_112 : f32 to vector<2x1xf32>
    %363 = arith.addf %362, %361 : vector<2x1xf32>
    %364 = math.log %363 : vector<2x1xf32>
    %365 = arith.addf %357, %364 : vector<2x1xf32>
    %366 = vector.shape_cast %365 : vector<2x1xf32> to vector<1x2x1xf32>
    %cst_113 = arith.constant dense<0.000000e+00> : vector<1xf32>
    %367 = vector.multi_reduction <add>, %366, %cst_113 [1, 2] : vector<1x2x1xf32> to vector<1xf32>
    %368 = vector.shape_cast %367 : vector<1xf32> to vector<1x1x1xf32>
    %369 = vector.extract %368[0, 0, 0] : f32 from vector<1x1x1xf32>
    %370 = vector.broadcast %369 : f32 to vector<1x1xf32>
    %cst_114 = arith.constant 2.000000e+00 : f32
    %371 = vector.broadcast %cst_114 : f32 to vector<1x1xf32>
    %372 = arith.divf %370, %371 : vector<1x1xf32>
    %c0_115 = arith.constant 0 : index
    %c0_116 = arith.constant 0 : index
    %373 = vector.load %arg11[%c0_115, %c0_116] : memref<1x1xf32, #tpu.memory_space<vmem>>, vector<1x1xf32>
    tpu.vector_store %arg11[%c0_115, %c0_116], %372 {strides = array<i32>} : memref<1x1xf32, #tpu.memory_space<vmem>>, vector<1x1xf32>,
    return
  }
}

</mosaic_0001>

<bundles_post_ra>
// kernel: tpu_custom_call.1
= control target key start
LH: loop header
LB: loop body
LE: loop exit
PB: predicated region body
PF: predicated region fallthrough
CT: control target
= control target key end

     0   :  { %17 = vsyncpa [#allocation3], 0  ;;  %s3665_s0 = inlined_call_operand.hbm [shape: f32[16,32], index: 0, kind: input, shape index: {}]   ;;  %s3666_s1 = inlined_call_operand.hbm [shape: f32[2,1,8], index: 1, kind: input, shape index: {}]   ;;  %s3667_s2 = inlined_call_operand.vmem [shape: f32[2,1], index: 2, kind: input, shape index: {}]   ;;  %s3668_s3 = inlined_call_operand.vmem [shape: f32[2,32,96], index: 3, kind: input, shape index: {}]   ;;  %s3669_s4 = inlined_call_operand.vmem [shape: f32[2,32,32], index: 4, kind: input, shape index: {}]   ;;  %s3670_s5 = inlined_call_operand.vmem [shape: f32[2,32,64], index: 5, kind: input, shape index: {}]   ;;  %s3671_s6 = inlined_call_operand.vmem [shape: f32[2,64,32], index: 6, kind: input, shape index: {}]   ;;  %s3672_s7 = inlined_call_operand.hbm [shape: f32[2,8,96], index: 7, kind: input, shape index: {}]   ;;  %s3673_s8 = inlined_call_operand.vmem [shape: f32[32,32], index: 8, kind: input, shape index: {}]   ;;  %s3674_s9 = inlined_call_operand.vmem [shape: f32[3,32], index: 9, kind: input, shape index: {}]   ;;  %s3675_s10 = inlined_call_operand.vmem [shape: f32[2,1], index: 10, kind: output, shape index: {0}]   ;;  %s3676_s11 = inlined_call_operand.hbm [shape: f32[1,1], index: 11, kind: output, shape index: {1}]  }
   0x1   :  { %18 = vsyncpa [#allocation6], 0 }
   0x2   :  { %19 = vsyncpa [#allocation4], 0  ;;  %s3121_s17 = smov [#allocation5]   ;;  %s3027_s21 = scalar_lea.hbm %s3666_s1, 32 }
   0x3   :  { %s37_s18 = sshll.u32 %s3121_s17, 4  ;;  %p3028_p0 = scmp.ne.s32.totalorder %s3666_s1, %s3027_s21  ;;  %s38_s18 = int_to_ptr.vmem [resolvable:$true] %s37_s18 }
   0x4   :  { %p3031_p1 = scmp.lt.u32.totalorder %s3027_s21, %s3666_s1 }
   0x6   :  { %p3033_p2 = pnand %p3031_p1, %p3028_p0 }
   0x8   :  { %3036 = shalt.err (!%p3033_p2)
}
   0x9   :  { %s3037_s26 = scalar_lea.vmem %s38_s18, 32  ;;  %p3042_p4 = scmp.lt.s32.totalorder %s38_s18, %s38_s18 }
   0xa   :  { %p3038_p3 = scmp.ne.s32.totalorder %s38_s18, %s3037_s26  ;;  %p3043_p5 = scmp.lt.s32.totalorder %s3037_s26, %s3037_s26 }
   0xc   :  { %p3044_p6 = por %p3043_p5, %p3042_p4 }
   0xe   :  { %p3045_p7 = pnand %p3044_p6, %p3038_p3 }
  0x10   :  { %3048 = shalt.err (!%p3045_p7)
}
  0x11   :  { %s3122_s27 = smov 16   ;;  %s3123_s28 = smov 1  }
  0x12   :  { %43 = dma.hbm_to_vmem [thread:$0]  %s3666_s1, 32, %s38_s18, [#allocation6], %s3122_s27, %s3122_s27, %s3123_s28  }
  0x13   :  { %s3124_s12 = smov [#allocation2]   ;;  %s3049_s16 = scalar_lea.hbm %s3665_s0, 256 }
  0x14   :  { %s25_s13 = sshll.u32 %s3124_s12, 4  ;;  %p3050_p8 = scmp.ne.s32.totalorder %s3665_s0, %s3049_s16  ;;  %s26_s13 = int_to_ptr.vmem [resolvable:$true] %s25_s13 }
  0x15   :  { %p3053_p9 = scmp.lt.u32.totalorder %s3049_s16, %s3665_s0 }
  0x17   :  { %p3055_p10 = pnand %p3053_p9, %p3050_p8 }
  0x19   :  { %3058 = shalt.err (!%p3055_p10)
}
  0x1a   :  { %s3059_s22 = scalar_lea.vmem %s26_s13, 256  ;;  %p3064_p12 = scmp.lt.s32.totalorder %s26_s13, %s26_s13 }
  0x1b   :  { %p3060_p11 = scmp.ne.s32.totalorder %s26_s13, %s3059_s22  ;;  %p3065_p13 = scmp.lt.s32.totalorder %s3059_s22, %s3059_s22 }
  0x1d   :  { %p3066_p0 = por %p3065_p13, %p3064_p12 }
  0x1f   :  { %p3067_p1 = pnand %p3066_p0, %p3060_p11 }
  0x21   :  { %3070 = shalt.err (!%p3067_p1)
}
  0x22   :  { %s3125_s1 = smov 128   ;;  %s3126_s18 = smov 8  }
  0x23   :  { %31 = dma.hbm_to_vmem [thread:$0]  %s3665_s0, 256, %s26_s13, [#allocation3], %s3125_s1, %s3125_s1, %s3126_s18  }
  0x24   :  { %s3127_s25 = smov [#allocation7]   ;;  %s3071_s30 = scalar_lea.hbm %s3672_s7, 256 }
  0x25   :  { %s59_s26 = sshll.u32 %s3127_s25, 4  ;;  %p3072_p2 = scmp.ne.s32.totalorder %s3672_s7, %s3071_s30  ;;  %s60_s26 = int_to_ptr.vmem [resolvable:$true] %s59_s26 }
  0x26   :  { %p3075_p3 = scmp.lt.u32.totalorder %s3071_s30, %s3672_s7 }
  0x28   :  { %p3077_p4 = pnand %p3075_p3, %p3072_p2 }
  0x2a   :  { %3080 = shalt.err (!%p3077_p4)
}
  0x2b   :  { %s3081_s17 = scalar_lea.vmem %s60_s26, 256  ;;  %p3086_p6 = scmp.lt.s32.totalorder %s60_s26, %s60_s26 }
  0x2c   :  { %p3082_p5 = scmp.ne.s32.totalorder %s60_s26, %s3081_s17  ;;  %p3087_p7 = scmp.lt.s32.totalorder %s3081_s17, %s3081_s17 }
  0x2e   :  { %p3088_p8 = por %p3087_p7, %p3086_p6 }
  0x30   :  { %p3089_p9 = pnand %p3088_p8, %p3082_p5 }
  0x32   :  { %3092 = shalt.err (!%p3089_p9)
}
  0x33   :  { %65 = dma.hbm_to_vmem [thread:$0]  %s3672_s7, 256, %s60_s26, [#allocation6], %s3125_s1, %s3125_s1, %s3126_s18  }
  0x34   :  { %3115 = dma.done.wait [#allocation3], 256  }
  0x35   :  { %3116 = vsyncadd [#allocation3], 4294967040 }
  0x36   :  { %3117 = dma.done.wait [#allocation6], 288  }
  0x37   :  { %3118 = vsyncadd [#allocation6], 4294967008  ;;  %vm92_vm0 = vcmask 261120   ;;  %v84_v0 = vld [vmem:[%s3668_s3] sm:$0xff]  ;;  %v85_v1 = vld [vmem:[%s3668_s3 + $0x8] sm:$0xff]  ;;  %v3128_v8 = vmov 0.0   ;;  %v88_v9 = vlaneseq }
  0x38   :  { %v86_v2 = vld [vmem:[%s3668_s3 + $0x10] sm:$0xff]  ;;  %v2861_v3 = vpack.c.bf16 %v85_v1, %v84_v0  ;;  %v87_v4 = vld [vmem:[%s3668_s3 + $0x18] sm:$0xff]  ;;  %v3247_v5 = vld [vmem:[#allocation2] sm:$0xff]  ;;  %2677 = vmatprep.subr.mxu1 %v3128_v8  ;;  %vm3129_vm1 = vmmov 0   ;;  %s3130_s1 = smov 64   ;;  %s3131_s18 = smov 96  }
  0x39   :  { %v2865_v6 = vpack.c.bf16 %v87_v4, %v86_v2  ;;  %2674 = vmatprep.mubr.msk.f32.mxu0 %vm92_vm0, %v3247_v5  ;;  %v3251_v7 = vld [vmem:[#allocation2 + $0x8] sm:$0xff]  ;;  %v3257_v10 = vshrl.u32 %v88_v9, 7  ;;  %2679 = vmatprep.mubr.msk.f32.mxu1 %vm3129_vm1, %v3128_v8  ;;  %v3266_v12 = vld [vmem:[#allocation7] sm:$0xff]  ;;  %s3132_s26 = smov 80   ;;  %s3133_s28 = smov 112   ;;  %vm183_vm2 = vcmask 130048  }
  0x3a   :  { %2862 = vmatprep.subr.bf16.mxu0 %v2861_v3  ;;  %v3290_v23 = vld [vmem:[#allocation5] ss:$0 sm:$0xff]  ;;  %vm258_vm3 = vcmask 64512   ;;  %v3296_v30 = vld [vmem:[#allocation5 + $0x1] ss:$0 sm:$0xff]  ;;  %s3134_s29 = smov 48  }
  0x3b   :  { %2864 = vmatpush3.bf16.msra.mxu0 %v2861_v3  ;;  %v3264_v11 = vsub.s32 0, %v3257_v10  ;;  %vm1105_vm4 = vcmask 523264   ;;  %vm2362_vm5 = vcmask 1040384   ;;  %vm2452_vm6 = vcmask 254976  }
  0x3c   :  { %2866 = vmatprep.subr.bf16.mxu0 %v2865_v6  ;;  %vm2461_vm7 = vcmask 1024   ;;  %vm2488_vm8 = vcmask 0  }
  0x3d   :  { %v91_v13 = vrot.slane %v3266_v12, %v3264_v11 }
  0x3f   :  { %2868 = vmatpush3.bf16.msra.mxu0 %v2865_v6 }
  0x40   :  { %2697 = vmatprep.subr.mxu0 %v3128_v8 }
  0x42   :  { %2675 = vmatmul.mubr.msk.f32.vlgmr.msra.gmra.mrb[0].mxu0 %vm92_vm0, %v3251_v7 }
  0x43   :  { %2699 = vmatprep.mubr.msk.f32.mxu0 %vm3129_vm1, %v3128_v8 }
 0x115   :  { %v2676_v14 = vpop.f32.mrb[0].mxu0 }
 0x116   :  { %v165_v15 = vpop.f32.mrb[1].mxu0  ;;  %v3274_v17 = vadd.f32 %v2676_v14, %v91_v13 }
 0x117   :  { %v166_v16 = vadd.f32 %v165_v15, %v91_v13 }
 0x119   :  { %270 = vrot.lane.b32.xlu1 %v166_v16, %s3130_s1  ;;  %181 = vrot.lane.b32.xlu0 %v166_v16, %s3131_s18 }
 0x11d   :  { %348 = vrot.lane.b32.xlu1 %v166_v16, %s3132_s26 }
 0x121   :  { %346 = vrot.lane.b32.xlu1 %v166_v16, %s3133_s28 }
 0x125   :  { %523 = vrot.lane.b32.xlu1 %v3274_v17, %s3131_s18 }
 0x18b   :  { %v271_v18 = vpop.permute.xlu1 %270  ;;  %v182_v19 = vpop.permute.xlu0 %181 }
 0x18c   :  { %2678 = vmatpush3.xpose.msk.msra.mxu1 %vm183_vm2, %v182_v19 }
 0x18d   :  { %2682 = vmatprep.subr.mxu1 %v3128_v8 }
 0x18f   :  { %v349_v20 = vpop.permute.xlu1 %348  ;;  %2680 = vmatmul.mubr.msk.f32.vlgmr.msra.gmra.mrb[0].mxu1 %vm183_vm2, %v166_v16 }
 0x190   :  { %2683 = vmatpush3.msra.mxu1 %v271_v18  ;;  %2684 = vmatprep.mubr.msk.f32.mxu1 %vm3129_vm1, %v3128_v8 }
 0x191   :  { %2687 = vmatprep.subr.mxu1 %v3128_v8 }
 0x193   :  { %v347_v21 = vpop.permute.xlu1 %346 }
 0x197   :  { %v524_v22 = vpop.permute.xlu1 %523 }
 0x198   :  { %2698 = vmatpush3.xpose.msk.msra.mxu0 %vm183_vm2, %v524_v22  ;;  %v856_v22 = vld [vmem:[%s3669_s4] sm:$0xff] }
 0x199   :  { %2707 = vmatprep.subr.mxu0 %v3128_v8 }
 0x19b   :  { %2700 = vmatmul.mubr.msk.f32.vlgmr.msra.gmra.mrb[2].mxu0 %vm183_vm2, %v3274_v17 }
 0x19c   :  { %2709 = vmatprep.mubr.msk.f32.mxu0 %vm3129_vm1, %v3128_v8 }
 0x262   :  { %v254_v24 = vpop.f32.mrb[0].mxu1 }
 0x263   :  { %v255_v25 = vadd.f32 %v3290_v23, %v254_v24  ;;  %v2681_v26 = vpop.f32.mrb[1].mxu1  ;;  %v857_v24 = vld [vmem:[%s3669_s4 + $0x8] sm:$0xff] }
 0x264   :  { %v858_v26 = vld [vmem:[%s3669_s4 + $0x10] sm:$0xff] }
 0x265   :  { %v259_v27 = vsel %vm258_vm3, %v255_v25, -inf }
 0x266   :  { %260 = vmax.xlane.f32.xlu0 %v259_v27  ;;  %v859_v27 = vld [vmem:[%s3669_s4 + $0x18] sm:$0xff] }
 0x26e   :  { %v595_v28 = vpop.f32.mrb[2].mxu0 }
 0x26f   :  { %v2701_v29 = vpop.f32.mrb[3].mxu0  ;;  %v596_v31 = vadd.f32 %v3296_v30, %v595_v28  ;;  %v2873_v28 = vpack.c.bf16 %v859_v27, %v858_v26  ;;  %v1094_v26 = vld [vmem:[%s3671_s6 + $0x8] sm:$0xff] }
 0x271   :  { %v599_v32 = vsel %vm258_vm3, %v596_v31, -inf }
 0x27c   :  { %686 = vrot.lane.b32.xlu0 %v3274_v17, %s3133_s28 }
 0x29b   :  { %600 = vmax.xlane.f32.xlu0 %v599_v32 }
 0x2b1   :  { %435 = vrot.lane.b32.xlu0 %v166_v16, %s3134_s29 }
 0x2f3   :  { %v261_v33 = vpop.xlane.xlu0 %260 }
 0x2f4   :  { %v262_v34 = vsub.f32 %v255_v25, %v261_v33  ;;  %v2869_v25 = vpack.c.bf16 %v857_v24, %v856_v22 }
 0x2f6   :  { %v263_v35 = vmul.f32 1.442695, %v262_v34 }
 0x2f7   :  { %v687_v40 = vpop.permute.xlu0 %686 }
 0x2f8   :  { %2965 = vpow2.f32 %v263_v35 }
 0x302   :  { %v2966_v36 = vpop.eup %2965 }
 0x303   :  { %v265_v37 = vsel %vm258_vm3, %v2966_v36, 0.0 }
 0x304   :  { %266 = vadd.xlane.f32.xlu1 %v265_v37 }
 0x315   :  { %688 = vrot.lane.b32.xlu1 %v3274_v17, %s3132_s26 }
 0x328   :  { %v601_v42 = vpop.xlane.xlu0 %600 }
 0x329   :  { %v602_v45 = vsub.f32 %v596_v31, %v601_v42 }
 0x32b   :  { %v603_v48 = vmul.f32 1.442695, %v602_v45 }
 0x32c   :  { %v436_v44 = vpop.permute.xlu0 %435 }
 0x391   :  { %v267_v38 = vpop.xlane.xlu1 %266 }
 0x392   :  { %2967 = vrcp.f32 %v267_v38 }
 0x393   :  { %2969 = vpow2.f32 %v603_v48 }
 0x395   :  { %v689_v39 = vpop.permute.xlu1 %688 }
 0x396   :  { %2708 = vmatpush3.xpose.msk.msra.mxu0 %vm183_vm2, %v689_v39 }
 0x397   :  { %2870 = vmatprep.subr.bf16.mxu0 %v2869_v25 }
 0x399   :  { %2710 = vmatmul.mubr.msk.f32.vlgmr.msra.gmra.mrb[4].mxu0 %vm183_vm2, %v687_v40  ;;  %v3356_v40 = vsub.s32 2, %v3257_v10 }
 0x39a   :  { %2872 = vmatpush3.bf16.msra.mxu0 %v2869_v25  ;;  %v1093_v25 = vld [vmem:[%s3671_s6] sm:$0xff] }
 0x39b   :  { %2874 = vmatprep.subr.bf16.mxu0 %v2873_v28  ;;  %v2885_v27 = vpack.c.bf16 %v1094_v26, %v1093_v25 }
 0x39c   :  { %v2968_v41 = vpop.eup %2967 }
 0x39d   :  { %v269_v43 = vmul.f32 %v2968_v41, %v2966_v36  ;;  %v2970_v57 = vpop.eup %2969  ;;  %v863_v41 = vrot.slane %v3266_v12, %v3356_v40 }
 0x39e   :  { %v605_v58 = vsel %vm258_vm3, %v2970_v57, 0.0  ;;  %2876 = vmatpush3.bf16.msra.mxu0 %v2873_v28  ;;  %v1095_v28 = vld [vmem:[%s3671_s6 + $0x10] sm:$0xff] }
 0x39f   :  { %2685 = vmatmul.mubr.msk.f32.vlgmr.msra.gmra.mrb[2].mxu1 %vm258_vm3, %v269_v43  ;;  %2886 = vmatprep.subr.bf16.mxu0 %v2885_v27 }
 0x3a0   :  { %2688 = vmatpush3.xpose.msk.msra.mxu1 %vm183_vm2, %v349_v20  ;;  %2689 = vmatprep.mubr.msk.f32.mxu1 %vm3129_vm1, %v3128_v8 }
 0x3a1   :  { %2692 = vmatprep.subr.mxu1 %v3128_v8 }
 0x3a3   :  { %2690 = vmatmul.mubr.msk.f32.vlgmr.msra.gmra.mrb[4].mxu1 %vm183_vm2, %v347_v21 }
 0x3a4   :  { %2693 = vmatpush3.msra.mxu1 %v436_v44  ;;  %2694 = vmatprep.mubr.msk.f32.mxu1 %vm3129_vm1, %v3128_v8 }
 0x3a5   :  { %2702 = vmatprep.subr.mxu1 %v3128_v8 }
 0x46c   :  { %v760_v46 = vpop.f32.mrb[4].mxu0 }
 0x46d   :  { %v2711_v47 = vpop.f32.mrb[5].mxu0  ;;  %v761_v54 = vadd.f32 %v3296_v30, %v760_v46 }
 0x46f   :  { %v764_v56 = vsel %vm258_vm3, %v761_v54, -inf }
 0x472   :  { %v3315_v49 = vpop.f32.mrb[2].mxu1 }
 0x473   :  { %v2686_v50 = vpop.f32.mrb[3].mxu1 }
 0x476   :  { %v420_v51 = vpop.f32.mrb[4].mxu1 }
 0x477   :  { %v421_v52 = vadd.f32 %v3290_v23, %v420_v51  ;;  %v2691_v53 = vpop.f32.mrb[5].mxu1 }
 0x479   :  { %v424_v55 = vsel %vm258_vm3, %v421_v52, -inf }
 0x47a   :  { %425 = vmax.xlane.f32.xlu1 %v424_v55 }
 0x47e   :  { %765 = vmax.xlane.f32.xlu1 %v764_v56 }
 0x482   :  { %606 = vadd.xlane.f32.xlu1 %v605_v58 }
 0x507   :  { %v426_v59 = vpop.xlane.xlu1 %425 }
 0x508   :  { %v427_v1 = vsub.f32 %v421_v52, %v426_v59  ;;  %v987_v59 = vld [vmem:[%s3670_s5 + $0x8] sm:$0xff] }
 0x50a   :  { %v428_v2 = vmul.f32 1.442695, %v427_v1 }
 0x50b   :  { %v766_v60 = vpop.xlane.xlu1 %765 }
 0x50c   :  { %v767_v61 = vsub.f32 %v761_v54, %v766_v60 }
 0x50e   :  { %v768_v62 = vmul.f32 1.442695, %v767_v61  ;;  %v988_v61 = vld [vmem:[%s3670_s5 + $0x10] sm:$0xff] }
 0x50f   :  { %v607_v6 = vpop.xlane.xlu1 %606 }
 0x510   :  { %2971 = vpow2.f32 %v768_v62  ;;  %v989_v62 = vld [vmem:[%s3670_s5 + $0x18] sm:$0xff] }
 0x511   :  { %2973 = vpow2.f32 %v428_v2 }
 0x51a   :  { %v2972_v63 = vpop.eup %2971 }
 0x51b   :  { %v770_v0 = vsel %vm258_vm3, %v2972_v63, 0.0  ;;  %v2974_v3 = vpop.eup %2973 }
 0x51c   :  { %771 = vadd.xlane.f32.xlu1 %v770_v0  ;;  %v430_v4 = vsel %vm258_vm3, %v2974_v3, 0.0 }
 0x52d   :  { %610 = vrot.lane.b32.xlu1 %v3274_v17, %s3130_s1 }
 0x551   :  { %431 = vadd.xlane.f32.xlu1 %v430_v4 }
 0x562   :  { %775 = vrot.lane.b32.xlu1 %v3274_v17, %s3134_s29 }
 0x5a9   :  { %v772_v9 = vpop.xlane.xlu1 %771 }
 0x5ad   :  { %v611_v13 = vpop.permute.xlu1 %610 }
 0x5de   :  { %v432_v14 = vpop.xlane.xlu1 %431 }
 0x5df   :  { %2975 = vrcp.f32 %v432_v14 }
 0x5e0   :  { %2977 = vrcp.f32 %v607_v6 }
 0x5e1   :  { %2979 = vrcp.f32 %v772_v9  ;;  %v976_v9 = vsub.s32 3, %v3257_v10 }
 0x5e2   :  { %v776_v20 = vpop.permute.xlu1 %775 }
 0x5e3   :  { %v977_v14 = vrot.slane %v3266_v12, %v976_v9 }
 0x5e9   :  { %v2976_v15 = vpop.eup %2975 }
 0x5ea   :  { %v434_v16 = vmul.f32 %v2976_v15, %v2974_v3  ;;  %v2978_v18 = vpop.eup %2977 }
 0x5eb   :  { %v609_v19 = vmul.f32 %v2978_v18, %v2970_v57  ;;  %v2980_v17 = vpop.eup %2979 }
 0x5ec   :  { %2695 = vmatmul.mubr.msk.f32.vlgmr.msra.gmra.mrb[6].mxu1 %vm258_vm3, %v434_v16  ;;  %v774_v21 = vmul.f32 %v2980_v17, %v2972_v63  ;;  %v2881_v63 = vpack.c.bf16 %v989_v62, %v988_v61  ;;  %v1103_v61 = vsub.s32 5, %v3257_v10 }
 0x5ed   :  { %2703 = vmatpush3.msra.mxu1 %v611_v13  ;;  %2704 = vmatprep.mubr.msk.f32.mxu1 %vm3129_vm1, %v3128_v8  ;;  %v982_v13 = vsub.s32 4, %v3257_v10 }
 0x5ee   :  { %2712 = vmatprep.subr.mxu1 %v3128_v8  ;;  %v1104_v62 = vrot.slane %v3266_v12, %v1103_v61 }
 0x5ef   :  { %v983_v18 = vrot.slane %v3266_v12, %v982_v13 }
 0x5f0   :  { %2705 = vmatmul.mubr.msk.f32.vlgmr.msra.gmra.mrb[8].mxu1 %vm258_vm3, %v609_v19 }
 0x5f1   :  { %2713 = vmatpush3.msra.mxu1 %v776_v20  ;;  %2714 = vmatprep.mubr.msk.f32.mxu1 %vm3129_vm1, %v3128_v8 }
 0x5f4   :  { %2715 = vmatmul.mubr.msk.f32.vlgmr.msra.gmra.mrb[10].mxu1 %vm258_vm3, %v774_v21 }
 0x6bf   :  { %v507_v29 = vpop.f32.mrb[6].mxu1 }
 0x6c0   :  { %512 = vrot.lane.b32.xlu0 %v507_v29, %s3122_s27  ;;  %v2696_v31 = vpop.f32.mrb[7].mxu1  ;;  %v1096_v29 = vld [vmem:[%s3671_s6 + $0x18] sm:$0xff] }
 0x6c1   :  { %v2889_v31 = vpack.c.bf16 %v1096_v29, %v1095_v28  ;;  %v2534_v29 = vld [vmem:[%s3668_s3 + $0x30] sm:$0xff] }
 0x6c3   :  { %v682_v32 = vpop.f32.mrb[8].mxu1 }
 0x6c4   :  { %v2706_v33 = vpop.f32.mrb[9].mxu1 }
 0x6c5   :  { %v1098_v33 = vld [vmem:[%s3671_s6 + $0x28] sm:$0xff] }
 0x6c7   :  { %v847_v34 = vpop.f32.mrb[10].mxu1 }
 0x6c8   :  { %852 = vrot.lane.b32.xlu1 %v847_v34, %s3122_s27  ;;  %v2716_v35 = vpop.f32.mrb[11].mxu1 }
 0x6c9   :  { %v1099_v35 = vld [vmem:[%s3671_s6 + $0x30] sm:$0xff] }
 0x732   :  { %v513_v36 = vpop.permute.xlu0 %512 }
 0x733   :  { %v515_v37 = vsel %vm183_vm2, %v3315_v49, %v513_v36  ;;  %v1100_v36 = vld [vmem:[%s3671_s6 + $0x38] sm:$0xff] }
 0x734   :  { %2725 = vmatprep.mubr.msk.f32.mxu0 %vm92_vm0, %v515_v37  ;;  %v2897_v37 = vpack.c.bf16 %v1100_v36, %v1099_v35 }
 0x73a   :  { %v853_v38 = vpop.permute.xlu1 %852 }
 0x73b   :  { %v855_v39 = vsel %vm183_vm2, %v682_v32, %v853_v38  ;;  %v1097_v32 = vld [vmem:[%s3671_s6 + $0x20] sm:$0xff]  ;;  %v3417_v38 = vsub.s32 1, %v3257_v10 }
 0x73c   :  { %2726 = vmatmul.mubr.msk.f32.vlgmr.msra.gmra.mrb[6].mxu0 %vm92_vm0, %v855_v39  ;;  %v2893_v34 = vpack.c.bf16 %v1098_v33, %v1097_v32 }
 0x73d   :  { %2888 = vmatpush3.bf16.msra.mxu0 %v2885_v27  ;;  %v993_v39 = vrot.slane %v3266_v12, %v3417_v38  ;;  %v2533_v27 = vld [vmem:[%s3668_s3 + $0x28] sm:$0xff] }
 0x73e   :  { %2890 = vmatprep.subr.bf16.mxu0 %v2889_v31 }
 0x741   :  { %2892 = vmatpush3.bf16.msra.mxu0 %v2889_v31  ;;  %v2535_v31 = vld [vmem:[%s3668_s3 + $0x38] sm:$0xff] }
 0x742   :  { %2894 = vmatprep.subr.bf16.mxu0 %v2893_v34  ;;  %v2905_v32 = vpack.c.bf16 %v2535_v31, %v2534_v29 }
 0x745   :  { %2896 = vmatpush3.bf16.msra.mxu0 %v2893_v34 }
 0x746   :  { %2898 = vmatprep.subr.bf16.mxu0 %v2897_v37 }
 0x749   :  { %2900 = vmatpush3.bf16.msra.mxu0 %v2897_v37 }
 0x74a   :  { %2779 = vmatprep.subr.mxu0 %v3128_v8 }
 0x80f   :  { %v2727_v42 = vpop.f32.mrb[6].mxu0 }
 0x810   :  { %v942_v43 = vadd.f32 %v2727_v42, %v863_v41  ;;  %v936_v44 = vpop.f32.mrb[7].mxu0 }
 0x811   :  { %v937_v45 = vadd.f32 %v936_v44, %v863_v41 }
 0x812   :  { %v946_v46 = vadd.f32 %v942_v43, %v3251_v7 }
 0x813   :  { %v945_v47 = vadd.f32 %v937_v45, %v3247_v5  ;;  %v986_v5 = vld [vmem:[%s3670_s5] sm:$0xff] }
 0x814   :  { %v950_v48 = vsel %vm92_vm0, %v946_v46, 0.0  ;;  %v2877_v60 = vpack.c.bf16 %v987_v59, %v986_v5 }
 0x815   :  { %951 = vadd.xlane.f32.xlu1 %v950_v48  ;;  %v947_v49 = vsel %vm92_vm0, %v945_v47, 0.0 }
 0x816   :  { %948 = vadd.xlane.f32.xlu0 %v947_v49  ;;  %2878 = vmatprep.subr.bf16.mxu1 %v2877_v60 }
 0x817   :  { %2880 = vmatpush3.bf16.msra.mxu1 %v2877_v60 }
 0x818   :  { %2882 = vmatprep.subr.bf16.mxu1 %v2881_v63 }
 0x81b   :  { %2884 = vmatpush3.bf16.msra.mxu1 %v2881_v63 }
 0x8a2   :  { %v952_v50 = vpop.xlane.xlu1 %951 }
 0x8a3   :  { %v955_v51 = vmul.f32 0.03125, %v952_v50  ;;  %v949_v52 = vpop.xlane.xlu0 %948 }
 0x8a4   :  { %v954_v53 = vmul.f32 0.03125, %v949_v52 }
 0x8a5   :  { %v957_v54 = vsub.f32 %v946_v46, %v955_v51 }
 0x8a6   :  { %v956_v55 = vsub.f32 %v945_v47, %v954_v53 }
 0x8a7   :  { %v959_v58 = vmul.f32 %v957_v54, %v957_v54 }
 0x8a8   :  { %v958_v56 = vmul.f32 %v956_v55, %v956_v55 }
 0x8a9   :  { %v963_v7 = vsel %vm92_vm0, %v959_v58, 0.0 }
 0x8aa   :  { %v960_v57 = vsel %vm92_vm0, %v958_v56, 0.0 }
 0x8ab   :  { %961 = vadd.xlane.f32.xlu0 %v960_v57 }
 0x8af   :  { %964 = vadd.xlane.f32.xlu0 %v963_v7 }
 0x938   :  { %v962_v0 = vpop.xlane.xlu0 %961 }
 0x939   :  { %v966_v1 = vmul.f32 0.03125, %v962_v0 }
 0x93b   :  { %v968_v2 = vadd.f32 1e-05, %v966_v1 }
 0x93c   :  { %v965_v3 = vpop.xlane.xlu0 %964 }
 0x93d   :  { %2981 = vrsqrt.f32 %v968_v2  ;;  %v967_v4 = vmul.f32 0.03125, %v965_v3 }
 0x93f   :  { %v969_v6 = vadd.f32 1e-05, %v967_v4 }
 0x941   :  { %2983 = vrsqrt.f32 %v969_v6 }
 0x947   :  { %v2982_v15 = vpop.eup %2981 }
 0x948   :  { %v972_v16 = vmul.f32 %v2982_v15, %v956_v55 }
 0x94a   :  { %v978_v19 = vmul.f32 %v977_v14, %v972_v16 }
 0x94b   :  { %v2984_v17 = vpop.eup %2983 }
 0x94c   :  { %v973_v20 = vmul.f32 %v2984_v17, %v957_v54  ;;  %v3386_v21 = vadd.f32 %v983_v18, %v978_v19 }
 0x94e   :  { %v979_v22 = vmul.f32 %v977_v14, %v973_v20  ;;  %2736 = vmatprep.mubr.msk.f32.mxu1 %vm92_vm0, %v3386_v21 }
 0x950   :  { %v985_v24 = vadd.f32 %v983_v18, %v979_v22 }
 0x952   :  { %2737 = vmatmul.mubr.msk.f32.vlgmr.msra.gmra.mrb[12].mxu1 %vm92_vm0, %v985_v24 }
 0xa25   :  { %v2738_v41 = vpop.f32.mrb[12].mxu1 }
 0xa26   :  { %v1072_v42 = vadd.f32 %v2738_v41, %v993_v39  ;;  %v1066_v43 = vpop.f32.mrb[13].mxu1  ;;  %v1217_v41 = vsub.s32 6, %v3257_v10 }
 0xa27   :  { %v1067_v44 = vadd.f32 %v1066_v43, %v993_v39 }
 0xa28   :  { %v1078_v45 = vmul.f32 0.044715, %v1072_v42  ;;  %v1076_v5 = vmul.f32 0.5, %v1072_v42  ;;  %v1218_v43 = vrot.slane %v3266_v12, %v1217_v41 }
 0xa29   :  { %v1077_v46 = vmul.f32 0.044715, %v1067_v44  ;;  %v1075_v58 = vmul.f32 0.5, %v1067_v44 }
 0xa2a   :  { %v1080_v47 = vmul.f32 %v1078_v45, %v1072_v42 }
 0xa2b   :  { %v1079_v48 = vmul.f32 %v1077_v46, %v1067_v44 }
 0xa2c   :  { %v1082_v49 = vmul.f32 %v1080_v47, %v1072_v42 }
 0xa2d   :  { %v1081_v50 = vmul.f32 %v1079_v48, %v1067_v44 }
 0xa2e   :  { %v1084_v51 = vadd.f32 %v1082_v49, %v1072_v42  ;;  %v1223_v42 = vsub.s32 7, %v3257_v10 }
 0xa2f   :  { %v1083_v52 = vadd.f32 %v1081_v50, %v1067_v44 }
 0xa30   :  { %v1086_v53 = vmul.f32 0.7978846, %v1084_v51  ;;  %v1224_v48 = vrot.slane %v3266_v12, %v1223_v42 }
 0xa31   :  { %v1085_v54 = vmul.f32 0.7978846, %v1083_v52 }
 0xa32   :  { %2985 = vtanh.f32 %v1086_v53  ;;  %v3465_v53 = vld [vmem:[#allocation7 + $0x8] sm:$0xff] }
 0xa33   :  { %2987 = vtanh.f32 %v1085_v54  ;;  %v1237_v12 = vrot.slane %v3465_v53, %v3264_v11 }
 0xa3c   :  { %v2986_v55 = vpop.eup %2985 }
 0xa3d   :  { %v2988_v56 = vpop.eup %2987  ;;  %v1090_v57 = vadd.f32 1.0, %v2986_v55 }
 0xa3e   :  { %v1089_v7 = vadd.f32 1.0, %v2988_v56 }
 0xa3f   :  { %v1092_v60 = vmul.f32 %v1090_v57, %v1076_v5 }
 0xa40   :  { %v1091_v59 = vmul.f32 %v1089_v7, %v1075_v58 }
 0xa42   :  { %2755 = vmatprep.mubr.msk.f32.mxu0 %vm1105_vm4, %v1091_v59 }
 0xa43   :  { %2756 = vmatmul.mubr.msk.f32.vlgmr.msra.gmra.mrb[8].mxu0 %vm1105_vm4, %v1092_v60 }
 0xa44   :  { %2781 = vmatprep.mubr.msk.f32.mxu0 %vm3129_vm1, %v3128_v8 }
 0xb16   :  { %v2757_v63 = vpop.f32.mrb[8].mxu0 }
 0xb17   :  { %v1184_v0 = vadd.f32 %v2757_v63, %v1104_v62  ;;  %v1178_v1 = vpop.f32.mrb[9].mxu0 }
 0xb18   :  { %v1179_v2 = vadd.f32 %v1178_v1, %v1104_v62 }
 0xb19   :  { %v1188_v3 = vadd.f32 %v1184_v0, %v985_v24 }
 0xb1a   :  { %v1187_v4 = vadd.f32 %v1179_v2, %v3386_v21  ;;  %v2532_v21 = vld [vmem:[%s3668_s3 + $0x20] sm:$0xff] }
 0xb1b   :  { %v1192_v6 = vsel %vm92_vm0, %v1188_v3, 0.0  ;;  %v2901_v28 = vpack.c.bf16 %v2533_v27, %v2532_v21 }
 0xb1c   :  { %1193 = vadd.xlane.f32.xlu0 %v1192_v6  ;;  %v1189_v14 = vsel %vm92_vm0, %v1187_v4, 0.0 }
 0xb1d   :  { %1190 = vadd.xlane.f32.xlu1 %v1189_v14  ;;  %2902 = vmatprep.subr.bf16.mxu1 %v2901_v28 }
 0xb1e   :  { %2904 = vmatpush3.bf16.msra.mxu1 %v2901_v28 }
 0xb1f   :  { %2906 = vmatprep.subr.bf16.mxu1 %v2905_v32 }
 0xb22   :  { %2908 = vmatpush3.bf16.msra.mxu1 %v2905_v32 }
 0xb23   :  { %2769 = vmatprep.subr.mxu1 %v3128_v8 }
 0xba9   :  { %v1194_v15 = vpop.xlane.xlu0 %1193 }
 0xbaa   :  { %v1196_v16 = vmul.f32 0.03125, %v1194_v15  ;;  %v1191_v18 = vpop.xlane.xlu1 %1190 }
 0xbab   :  { %v1195_v19 = vmul.f32 0.03125, %v1191_v18 }
 0xbac   :  { %v1198_v17 = vsub.f32 %v1188_v3, %v1196_v16 }
 0xbad   :  { %v1197_v20 = vsub.f32 %v1187_v4, %v1195_v19 }
 0xbae   :  { %v1200_v22 = vmul.f32 %v1198_v17, %v1198_v17 }
 0xbaf   :  { %v1199_v25 = vmul.f32 %v1197_v20, %v1197_v20 }
 0xbb0   :  { %v1204_v26 = vsel %vm92_vm0, %v1200_v22, 0.0 }
 0xbb1   :  { %1205 = vadd.xlane.f32.xlu0 %v1204_v26  ;;  %v1201_v24 = vsel %vm92_vm0, %v1199_v25, 0.0 }
 0xbb2   :  { %1202 = vadd.xlane.f32.xlu1 %v1201_v24 }
 0xc3e   :  { %v1206_v33 = vpop.xlane.xlu0 %1205 }
 0xc3f   :  { %v1208_v34 = vmul.f32 0.03125, %v1206_v33  ;;  %v1203_v35 = vpop.xlane.xlu1 %1202 }
 0xc40   :  { %v1207_v36 = vmul.f32 0.03125, %v1203_v35 }
 0xc41   :  { %v1210_v37 = vadd.f32 1e-05, %v1208_v34 }
 0xc42   :  { %v1209_v39 = vadd.f32 1e-05, %v1207_v36 }
 0xc43   :  { %2989 = vrsqrt.f32 %v1210_v37 }
 0xc44   :  { %2991 = vrsqrt.f32 %v1209_v39 }
 0xc4d   :  { %v2990_v44 = vpop.eup %2989 }
 0xc4e   :  { %v2992_v45 = vpop.eup %2991  ;;  %v1214_v46 = vmul.f32 %v2990_v44, %v1198_v17 }
 0xc4f   :  { %v1213_v47 = vmul.f32 %v2992_v45, %v1197_v20 }
 0xc50   :  { %v1220_v49 = vmul.f32 %v1218_v43, %v1214_v46 }
 0xc51   :  { %v1219_v50 = vmul.f32 %v1218_v43, %v1213_v47 }
 0xc52   :  { %v3457_v52 = vadd.f32 %v1224_v48, %v1220_v49 }
 0xc53   :  { %v3455_v51 = vadd.f32 %v1224_v48, %v1219_v50 }
 0xc55   :  { %2766 = vmatprep.mubr.msk.f32.mxu1 %vm92_vm0, %v3455_v51 }
 0xc56   :  { %2767 = vmatmul.mubr.msk.f32.vlgmr.msra.gmra.mrb[14].mxu1 %vm92_vm0, %v3457_v52 }
 0xc57   :  { %2771 = vmatprep.mubr.msk.f32.mxu1 %vm3129_vm1, %v3128_v8 }
 0xd29   :  { %v2768_v54 = vpop.f32.mrb[14].mxu1 }
 0xd2a   :  { %v1310_v55 = vpop.f32.mrb[15].mxu1  ;;  %v3475_v57 = vadd.f32 %v2768_v54, %v1237_v12 }
 0xd2b   :  { %v3469_v56 = vadd.f32 %v1310_v55, %v1237_v12 }
 0xd2d   :  { %1485 = vrot.lane.b32.xlu0 %v3469_v56, %s3132_s26  ;;  %1320 = vrot.lane.b32.xlu1 %v3469_v56, %s3131_s18 }
 0xd31   :  { %1819 = vrot.lane.b32.xlu0 %v3475_v57, %s3132_s26  ;;  %1483 = vrot.lane.b32.xlu1 %v3469_v56, %s3133_s28 }
 0xd35   :  { %1654 = vrot.lane.b32.xlu1 %v3475_v57, %s3131_s18 }
 0xd39   :  { %1817 = vrot.lane.b32.xlu1 %v3475_v57, %s3133_s28 }
 0xd9f   :  { %v1486_v58 = vpop.permute.xlu0 %1485  ;;  %v1321_v7 = vpop.permute.xlu1 %1320 }
 0xda0   :  { %2770 = vmatpush3.xpose.msk.msra.mxu1 %vm183_vm2, %v1321_v7  ;;  %2780 = vmatpush3.xpose.msk.msra.mxu0 %vm183_vm2, %v1486_v58 }
 0xda1   :  { %2789 = vmatprep.subr.mxu0 %v3128_v8  ;;  %2774 = vmatprep.subr.mxu1 %v3128_v8 }
 0xda3   :  { %2772 = vmatmul.mubr.msk.f32.vlgmr.msra.gmra.mrb[16].mxu1 %vm183_vm2, %v3469_v56  ;;  %v1484_v5 = vpop.permute.xlu1 %1483  ;;  %v1820_v60 = vpop.permute.xlu0 %1819 }
 0xda4   :  { %2782 = vmatmul.mubr.msk.f32.vlgmr.msra.gmra.mrb[10].mxu0 %vm183_vm2, %v1484_v5  ;;  %2776 = vmatprep.mubr.msk.f32.mxu1 %vm3129_vm1, %v3128_v8 }
 0xda5   :  { %2791 = vmatprep.mubr.msk.f32.mxu0 %vm3129_vm1, %v3128_v8 }
 0xda7   :  { %v1655_v59 = vpop.permute.xlu1 %1654 }
 0xda8   :  { %2790 = vmatpush3.xpose.msk.msra.mxu0 %vm183_vm2, %v1655_v59 }
 0xda9   :  { %2799 = vmatprep.subr.mxu0 %v3128_v8 }
 0xdab   :  { %2792 = vmatmul.mubr.msk.f32.vlgmr.msra.gmra.mrb[12].mxu0 %vm183_vm2, %v3475_v57  ;;  %v1818_v62 = vpop.permute.xlu1 %1817 }
 0xdac   :  { %2800 = vmatpush3.xpose.msk.msra.mxu0 %vm183_vm2, %v1820_v60  ;;  %2801 = vmatprep.mubr.msk.f32.mxu0 %vm3129_vm1, %v3128_v8 }
 0xdaf   :  { %2802 = vmatmul.mubr.msk.f32.vlgmr.msra.gmra.mrb[14].mxu0 %vm183_vm2, %v1818_v62 }
 0xe76   :  { %v1392_v63 = vpop.f32.mrb[16].mxu1 }
 0xe77   :  { %v1393_v0 = vadd.f32 %v3290_v23, %v1392_v63  ;;  %v2773_v1 = vpop.f32.mrb[17].mxu1  ;;  %v1557_v2 = vpop.f32.mrb[10].mxu0 }
 0xe78   :  { %v1558_v3 = vadd.f32 %v3290_v23, %v1557_v2  ;;  %v2783_v4 = vpop.f32.mrb[11].mxu0  ;;  %v2551_v1 = vld [vmem:[%s3669_s4 + $0x28] sm:$0xff] }
 0xe79   :  { %v1396_v6 = vsel %vm258_vm3, %v1393_v0, -inf  ;;  %v2553_v4 = vld [vmem:[%s3669_s4 + $0x38] sm:$0xff] }
 0xe7a   :  { %1397 = vmax.xlane.f32.xlu0 %v1396_v6  ;;  %v1561_v14 = vsel %vm258_vm3, %v1558_v3, -inf }
 0xe7b   :  { %1562 = vmax.xlane.f32.xlu1 %v1561_v14 }
 0xe7e   :  { %v1726_v15 = vpop.f32.mrb[12].mxu0 }
 0xe7f   :  { %v1727_v16 = vadd.f32 %v3296_v30, %v1726_v15  ;;  %v2793_v18 = vpop.f32.mrb[13].mxu0 }
 0xe81   :  { %v1730_v19 = vsel %vm258_vm3, %v1727_v16, -inf }
 0xe82   :  { %1731 = vmax.xlane.f32.xlu0 %v1730_v19  ;;  %v1891_v17 = vpop.f32.mrb[14].mxu0 }
 0xe83   :  { %v1892_v20 = vadd.f32 %v3296_v30, %v1891_v17  ;;  %v2803_v22 = vpop.f32.mrb[15].mxu0 }
 0xe85   :  { %v1895_v23 = vsel %vm258_vm3, %v1892_v20, -inf }
 0xe86   :  { %1896 = vmax.xlane.f32.xlu0 %v1895_v23 }
 0xe8c   :  { %1407 = vrot.lane.b32.xlu1 %v3469_v56, %s3130_s1 }
 0xf07   :  { %v1398_v25 = vpop.xlane.xlu0 %1397 }
 0xf08   :  { %v1399_v26 = vsub.f32 %v1393_v0, %v1398_v25  ;;  %v1563_v24 = vpop.xlane.xlu1 %1562  ;;  %v2550_v0 = vld [vmem:[%s3669_s4 + $0x20] sm:$0xff] }
 0xf09   :  { %v1564_v21 = vsub.f32 %v1558_v3, %v1563_v24  ;;  %v2909_v2 = vpack.c.bf16 %v2551_v1, %v2550_v0  ;;  %v2552_v3 = vld [vmem:[%s3669_s4 + $0x30] sm:$0xff] }
 0xf0a   :  { %v1400_v27 = vmul.f32 1.442695, %v1399_v26  ;;  %v2913_v6 = vpack.c.bf16 %v2553_v4, %v2552_v3 }
 0xf0b   :  { %v1565_v28 = vmul.f32 1.442695, %v1564_v21  ;;  %2910 = vmatprep.subr.bf16.mxu0 %v2909_v2  ;;  %v1995_v21 = vrot.slane %v3465_v53, %v3356_v40 }
 0xf0c   :  { %2993 = vpow2.f32 %v1400_v27  ;;  %v1408_v29 = vpop.permute.xlu1 %1407  ;;  %2912 = vmatpush3.bf16.msra.mxu0 %v2909_v2 }
 0xf0d   :  { %2995 = vpow2.f32 %v1565_v28  ;;  %2775 = vmatpush3.msra.mxu1 %v1408_v29  ;;  %2914 = vmatprep.subr.bf16.mxu0 %v2913_v6 }
 0xf0e   :  { %2784 = vmatprep.subr.mxu1 %v3128_v8 }
 0xf0f   :  { %v1732_v30 = vpop.xlane.xlu0 %1731 }
 0xf10   :  { %v1733_v31 = vsub.f32 %v1727_v16, %v1732_v30  ;;  %2916 = vmatpush3.bf16.msra.mxu0 %v2913_v6 }
 0xf12   :  { %v1734_v32 = vmul.f32 1.442695, %v1733_v31 }
 0xf13   :  { %v1897_v33 = vpop.xlane.xlu0 %1896 }
 0xf14   :  { %2997 = vpow2.f32 %v1734_v32  ;;  %v1898_v34 = vsub.f32 %v1892_v20, %v1897_v33 }
 0xf16   :  { %v2994_v35 = vpop.eup %2993  ;;  %v1899_v36 = vmul.f32 1.442695, %v1898_v34 }
 0xf17   :  { %v2996_v37 = vpop.eup %2995  ;;  %v1402_v39 = vsel %vm258_vm3, %v2994_v35, 0.0 }
 0xf18   :  { %2999 = vpow2.f32 %v1899_v36  ;;  %1403 = vadd.xlane.f32.xlu1 %v1402_v39  ;;  %v1567_v43 = vsel %vm258_vm3, %v2996_v37, 0.0 }
 0xf19   :  { %1568 = vadd.xlane.f32.xlu0 %v1567_v43 }
 0xf1e   :  { %v2998_v44 = vpop.eup %2997 }
 0xf1f   :  { %v1736_v45 = vsel %vm258_vm3, %v2998_v44, 0.0 }
 0xf20   :  { %1737 = vadd.xlane.f32.xlu1 %v1736_v45 }
 0xf22   :  { %v3000_v46 = vpop.eup %2999 }
 0xf23   :  { %v1901_v47 = vsel %vm258_vm3, %v3000_v46, 0.0 }
 0xf24   :  { %1902 = vadd.xlane.f32.xlu0 %v1901_v47 }
 0xf31   :  { %1741 = vrot.lane.b32.xlu1 %v3475_v57, %s3130_s1 }
 0xf35   :  { %1906 = vrot.lane.b32.xlu1 %v3475_v57, %s3134_s29 }
 0xf3a   :  { %1572 = vrot.lane.b32.xlu0 %v3469_v56, %s3134_s29 }
 0xfa5   :  { %v1404_v48 = vpop.xlane.xlu1 %1403 }
 0xfa6   :  { %3001 = vrcp.f32 %v1404_v48  ;;  %v1569_v49 = vpop.xlane.xlu0 %1568  ;;  %v2557_v48 = vld [vmem:[%s3670_s5 + $0x28] sm:$0xff] }
 0xfa7   :  { %3003 = vrcp.f32 %v1569_v49 }
 0xfad   :  { %v1738_v50 = vpop.xlane.xlu1 %1737 }
 0xfae   :  { %3005 = vrcp.f32 %v1738_v50  ;;  %v2558_v50 = vld [vmem:[%s3670_s5 + $0x30] sm:$0xff] }
 0xfb0   :  { %v3002_v12 = vpop.eup %3001 }
 0xfb1   :  { %v1406_v54 = vmul.f32 %v3002_v12, %v2994_v35  ;;  %v1903_v55 = vpop.xlane.xlu0 %1902  ;;  %v3004_v58 = vpop.eup %3003  ;;  %v2559_v12 = vld [vmem:[%s3670_s5 + $0x38] sm:$0xff] }
 0xfb2   :  { %3007 = vrcp.f32 %v1903_v55  ;;  %v1571_v57 = vmul.f32 %v3004_v58, %v2996_v37  ;;  %v1742_v7 = vpop.permute.xlu1 %1741 }
 0xfb3   :  { %2777 = vmatmul.mubr.msk.f32.vlgmr.msra.gmra.mrb[18].mxu1 %vm258_vm3, %v1406_v54  ;;  %v2921_v54 = vpack.c.bf16 %v2559_v12, %v2558_v50 }
 0xfb4   :  { %2786 = vmatprep.mubr.msk.f32.mxu1 %vm3129_vm1, %v3128_v8 }
 0xfb5   :  { %v1573_v5 = vpop.permute.xlu0 %1572 }
 0xfb6   :  { %2785 = vmatpush3.msra.mxu1 %v1573_v5  ;;  %v1907_v60 = vpop.permute.xlu1 %1906 }
 0xfb7   :  { %2787 = vmatmul.mubr.msk.f32.vlgmr.msra.gmra.mrb[20].mxu1 %vm258_vm3, %v1571_v57  ;;  %2794 = vmatprep.subr.mxu1 %v3128_v8 }
 0xfb8   :  { %v3006_v56 = vpop.eup %3005  ;;  %2795 = vmatpush3.msra.mxu1 %v1742_v7  ;;  %2796 = vmatprep.mubr.msk.f32.mxu1 %vm3129_vm1, %v3128_v8 }
 0xfb9   :  { %v1740_v59 = vmul.f32 %v3006_v56, %v2998_v44  ;;  %2804 = vmatprep.subr.mxu1 %v3128_v8 }
 0xfbb   :  { %2797 = vmatmul.mubr.msk.f32.vlgmr.msra.gmra.mrb[22].mxu1 %vm258_vm3, %v1740_v59  ;;  %v2108_v59 = vrot.slane %v3465_v53, %v976_v9  ;;  %v2562_v9 = vld [vmem:[%s3671_s6 + $0x40] sm:$0xff] }
 0xfbc   :  { %v3008_v62 = vpop.eup %3007  ;;  %2805 = vmatpush3.msra.mxu1 %v1907_v60  ;;  %2806 = vmatprep.mubr.msk.f32.mxu1 %vm3129_vm1, %v3128_v8 }
 0xfbd   :  { %v1905_v63 = vmul.f32 %v3008_v62, %v3000_v46 }
 0xfbf   :  { %2807 = vmatmul.mubr.msk.f32.vlgmr.msra.gmra.mrb[24].mxu1 %vm258_vm3, %v1905_v63  ;;  %v2114_v63 = vrot.slane %v3465_v53, %v982_v13  ;;  %v2563_v13 = vld [vmem:[%s3671_s6 + $0x48] sm:$0xff] }
0x1086   :  { %v1479_v14 = vpop.f32.mrb[18].mxu1 }
0x1087   :  { %v2778_v15 = vpop.f32.mrb[19].mxu1 }
0x1088   :  { %v2564_v15 = vld [vmem:[%s3671_s6 + $0x50] sm:$0xff] }
0x108a   :  { %v1644_v16 = vpop.f32.mrb[20].mxu1 }
0x108b   :  { %1649 = vrot.lane.b32.xlu0 %v1644_v16, %s3122_s27  ;;  %v2788_v18 = vpop.f32.mrb[21].mxu1  ;;  %v2565_v16 = vld [vmem:[%s3671_s6 + $0x58] sm:$0xff] }
0x108c   :  { %v2929_v18 = vpack.c.bf16 %v2565_v16, %v2564_v15 }
0x108e   :  { %v1813_v19 = vpop.f32.mrb[22].mxu1 }
0x108f   :  { %v2798_v17 = vpop.f32.mrb[23].mxu1 }
0x1092   :  { %v1978_v20 = vpop.f32.mrb[24].mxu1 }
0x1093   :  { %1983 = vrot.lane.b32.xlu1 %v1978_v20, %s3122_s27  ;;  %v2808_v22 = vpop.f32.mrb[25].mxu1  ;;  %v2568_v20 = vld [vmem:[%s3671_s6 + $0x70] sm:$0xff] }
0x1094   :  { %v2569_v22 = vld [vmem:[%s3671_s6 + $0x78] sm:$0xff] }
0x10fd   :  { %v1650_v23 = vpop.permute.xlu0 %1649 }
0x10fe   :  { %v1652_v25 = vsel %vm183_vm2, %v1479_v14, %v1650_v23  ;;  %v2925_v14 = vpack.c.bf16 %v2563_v13, %v2562_v9  ;;  %v2937_v23 = vpack.c.bf16 %v2569_v22, %v2568_v20  ;;  %v2367_v9 = vld [vmem:[%s3673_s8 + $0x10] sm:$0xff]  ;;  %v2368_v13 = vld [vmem:[%s3673_s8 + $0x18] sm:$0xff]  ;;  %v2350_v22 = vrot.slane %v3465_v53, %v1217_v41  ;;  %v2364_v41 = vld [vmem:[%s3674_s9] sm:$0x7] }
0x10ff   :  { %2817 = vmatprep.mubr.msk.f32.mxu0 %vm92_vm0, %v1652_v25  ;;  %v2125_v25 = vrot.slane %v3465_v53, %v3417_v38  ;;  %v2945_v15 = vpack.c.bf16 %v2368_v13, %v2367_v9 }
0x1100   :  { %2926 = vmatprep.subr.bf16.mxu0 %v2925_v14 }
0x1105   :  { %v1984_v26 = vpop.permute.xlu1 %1983 }
0x1106   :  { %v1986_v24 = vsel %vm183_vm2, %v1813_v19, %v1984_v26  ;;  %v2567_v19 = vld [vmem:[%s3671_s6 + $0x68] sm:$0xff] }
0x1107   :  { %2818 = vmatmul.mubr.msk.f32.vlgmr.msra.gmra.mrb[16].mxu0 %vm92_vm0, %v1986_v24 }
0x1108   :  { %2928 = vmatpush3.bf16.msra.mxu0 %v2925_v14  ;;  %v3135_v14 = vmov 0.0|0.0  }
0x1109   :  { %2930 = vmatprep.subr.bf16.mxu0 %v2929_v18 }
0x110c   :  { %2932 = vmatpush3.bf16.msra.mxu0 %v2929_v18 }
0x11da   :  { %v2819_v27 = vpop.f32.mrb[16].mxu0 }
0x11db   :  { %v2074_v28 = vadd.f32 %v2819_v27, %v1995_v21  ;;  %v2068_v29 = vpop.f32.mrb[17].mxu0 }
0x11dc   :  { %v2069_v30 = vadd.f32 %v2068_v29, %v1995_v21 }
0x11dd   :  { %v2078_v31 = vadd.f32 %v2074_v28, %v3457_v52 }
0x11de   :  { %v2077_v32 = vadd.f32 %v2069_v30, %v3455_v51  ;;  %v2556_v51 = vld [vmem:[%s3670_s5 + $0x20] sm:$0xff] }
0x11df   :  { %v2082_v33 = vsel %vm92_vm0, %v2078_v31, 0.0  ;;  %v2917_v49 = vpack.c.bf16 %v2557_v48, %v2556_v51  ;;  %v2237_v48 = vrot.slane %v3465_v53, %v1103_v61 }
0x11e0   :  { %2083 = vadd.xlane.f32.xlu1 %v2082_v33  ;;  %v2079_v34 = vsel %vm92_vm0, %v2077_v32, 0.0 }
0x11e1   :  { %2080 = vadd.xlane.f32.xlu0 %v2079_v34  ;;  %2918 = vmatprep.subr.bf16.mxu1 %v2917_v49 }
0x11e2   :  { %2920 = vmatpush3.bf16.msra.mxu1 %v2917_v49 }
0x11e3   :  { %2922 = vmatprep.subr.bf16.mxu1 %v2921_v54 }
0x11e6   :  { %2924 = vmatpush3.bf16.msra.mxu1 %v2921_v54 }
0x11e7   :  { %2941 = vmatprep.subr.bf16.mxu1 %v3135_v14 }
0x126d   :  { %v2084_v35 = vpop.xlane.xlu1 %2083 }
0x126e   :  { %v2086_v36 = vmul.f32 0.03125, %v2084_v35  ;;  %v2081_v37 = vpop.xlane.xlu0 %2080 }
0x126f   :  { %v2085_v39 = vmul.f32 0.03125, %v2081_v37 }
0x1270   :  { %v2088_v43 = vsub.f32 %v2078_v31, %v2086_v36 }
0x1271   :  { %v2087_v44 = vsub.f32 %v2077_v32, %v2085_v39 }
0x1272   :  { %v2090_v47 = vmul.f32 %v2088_v43, %v2088_v43 }
0x1273   :  { %v2089_v45 = vmul.f32 %v2087_v44, %v2087_v44 }
0x1274   :  { %v2094_v52 = vsel %vm92_vm0, %v2090_v47, 0.0 }
0x1275   :  { %v2091_v46 = vsel %vm92_vm0, %v2089_v45, 0.0 }
0x1276   :  { %2092 = vadd.xlane.f32.xlu0 %v2091_v46 }
0x127a   :  { %2095 = vadd.xlane.f32.xlu0 %v2094_v52 }
0x1303   :  { %v2093_v55 = vpop.xlane.xlu0 %2092 }
0x1304   :  { %v2097_v58 = vmul.f32 0.03125, %v2093_v55 }
0x1306   :  { %v2099_v57 = vadd.f32 1e-05, %v2097_v58 }
0x1307   :  { %v2096_v7 = vpop.xlane.xlu0 %2095 }
0x1308   :  { %3009 = vrsqrt.f32 %v2099_v57  ;;  %v2098_v5 = vmul.f32 0.03125, %v2096_v7 }
0x130a   :  { %v2100_v56 = vadd.f32 1e-05, %v2098_v5 }
0x130c   :  { %3011 = vrsqrt.f32 %v2100_v56 }
0x1312   :  { %v3010_v60 = vpop.eup %3009 }
0x1313   :  { %v2103_v62 = vmul.f32 %v3010_v60, %v2087_v44 }
0x1315   :  { %v2109_v0 = vmul.f32 %v2108_v59, %v2103_v62 }
0x1316   :  { %v3012_v1 = vpop.eup %3011 }
0x1317   :  { %v2104_v2 = vmul.f32 %v3012_v1, %v2088_v43  ;;  %v2115_v3 = vadd.f32 %v2114_v63, %v2109_v0 }
0x1319   :  { %v2110_v4 = vmul.f32 %v2108_v59, %v2104_v2  ;;  %2828 = vmatprep.mubr.msk.f32.mxu1 %vm92_vm0, %v2115_v3 }
0x131b   :  { %v2116_v6 = vadd.f32 %v2114_v63, %v2110_v4  ;;  %v2366_v4 = vld [vmem:[%s3673_s8 + $0x8] sm:$0xff] }
0x131d   :  { %2829 = vmatmul.mubr.msk.f32.vlgmr.msra.gmra.mrb[26].mxu1 %vm92_vm0, %v2116_v6 }
0x131e   :  { %2858 = vmatprep.mubr.msk.f32.mxu1 %vm3129_vm1, %v3128_v8  ;;  %v2566_v8 = vld [vmem:[%s3671_s6 + $0x60] sm:$0xff] }
0x131f   :  { %v2933_v17 = vpack.c.bf16 %v2567_v19, %v2566_v8 }
0x1321   :  { %2934 = vmatprep.subr.bf16.mxu0 %v2933_v17 }
0x1322   :  { %2936 = vmatpush3.bf16.msra.mxu0 %v2933_v17 }
0x1323   :  { %2938 = vmatprep.subr.bf16.mxu0 %v2937_v23 }
0x1326   :  { %2940 = vmatpush3.bf16.msra.mxu0 %v2937_v23 }
0x13f0   :  { %v2830_v26 = vpop.f32.mrb[26].mxu1 }
0x13f1   :  { %v2204_v24 = vadd.f32 %v2830_v26, %v2125_v25  ;;  %v2198_v21 = vpop.f32.mrb[27].mxu1 }
0x13f2   :  { %v2199_v27 = vadd.f32 %v2198_v21, %v2125_v25 }
0x13f3   :  { %v2210_v28 = vmul.f32 0.044715, %v2204_v24  ;;  %v2208_v47 = vmul.f32 0.5, %v2204_v24 }
0x13f4   :  { %v2209_v29 = vmul.f32 0.044715, %v2199_v27  ;;  %v2207_v45 = vmul.f32 0.5, %v2199_v27 }
0x13f5   :  { %v2212_v30 = vmul.f32 %v2210_v28, %v2204_v24 }
0x13f6   :  { %v2211_v31 = vmul.f32 %v2209_v29, %v2199_v27 }
0x13f7   :  { %v2214_v32 = vmul.f32 %v2212_v30, %v2204_v24 }
0x13f8   :  { %v2213_v33 = vmul.f32 %v2211_v31, %v2199_v27 }
0x13f9   :  { %v2216_v34 = vadd.f32 %v2214_v32, %v2204_v24  ;;  %v2356_v24 = vrot.slane %v3465_v53, %v1223_v42  ;;  %v2450_v42 = vrot.slane %v2364_v41, %v3417_v38 }
0x13fa   :  { %v2215_v35 = vadd.f32 %v2213_v33, %v2199_v27  ;;  %v2372_v33 = vrot.slane %v2364_v41, %v3264_v11 }
0x13fb   :  { %v2218_v36 = vmul.f32 0.7978846, %v2216_v34 }
0x13fc   :  { %v2217_v37 = vmul.f32 0.7978846, %v2215_v35 }
0x13fd   :  { %3013 = vtanh.f32 %v2218_v36 }
0x13fe   :  { %3015 = vtanh.f32 %v2217_v37 }
0x1407   :  { %v3014_v39 = vpop.eup %3013 }
0x1408   :  { %v3016_v43 = vpop.eup %3015  ;;  %v2222_v44 = vadd.f32 1.0, %v3014_v39  ;;  %v2459_v39 = vrot.slane %v2364_v41, %v3356_v40 }
0x1409   :  { %v2221_v46 = vadd.f32 1.0, %v3016_v43 }
0x140a   :  { %v2224_v51 = vmul.f32 %v2222_v44, %v2208_v47 }
0x140b   :  { %v2223_v52 = vmul.f32 %v2221_v46, %v2207_v45 }
0x140d   :  { %2847 = vmatprep.mubr.msk.f32.mxu0 %vm1105_vm4, %v2223_v52  ;;  %v2463_v52 = vld [vmem:[%s3667_s2] sm:$0x3] }
0x140e   :  { %2848 = vmatmul.mubr.msk.f32.vlgmr.msra.gmra.mrb[18].mxu0 %vm1105_vm4, %v2224_v51 }
0x14e1   :  { %v2849_v49 = vpop.f32.mrb[18].mxu0 }
0x14e2   :  { %v2316_v50 = vadd.f32 %v2849_v49, %v2237_v48  ;;  %v2310_v12 = vpop.f32.mrb[19].mxu0 }
0x14e3   :  { %v2311_v54 = vadd.f32 %v2310_v12, %v2237_v48 }
0x14e4   :  { %v2320_v55 = vadd.f32 %v2316_v50, %v2116_v6 }
0x14e5   :  { %v2319_v58 = vadd.f32 %v2311_v54, %v2115_v3  ;;  %v2365_v3 = vld [vmem:[%s3673_s8] sm:$0xff] }
0x14e6   :  { %v2324_v57 = vsel %vm92_vm0, %v2320_v55, 0.0  ;;  %v2942_v6 = vpack.c.bf16 %v2366_v4, %v2365_v3 }
0x14e7   :  { %2325 = vadd.xlane.f32.xlu1 %v2324_v57  ;;  %v2321_v7 = vsel %vm92_vm0, %v2319_v58, 0.0 }
0x14e8   :  { %2322 = vadd.xlane.f32.xlu0 %v2321_v7  ;;  %2943 = vmatpush3.bf16.msra.mxu1 %v2942_v6 }
0x14e9   :  { %2944 = vmatprep.subr.bf16.mxu1 %v3135_v14 }
0x14ec   :  { %2946 = vmatpush3.bf16.msra.mxu1 %v2945_v15 }
0x1574   :  { %v2326_v5 = vpop.xlane.xlu1 %2325 }
0x1575   :  { %v2328_v56 = vmul.f32 0.03125, %v2326_v5  ;;  %v2323_v59 = vpop.xlane.xlu0 %2322 }
0x1576   :  { %v2327_v60 = vmul.f32 0.03125, %v2323_v59 }
0x1577   :  { %v2330_v62 = vsub.f32 %v2320_v55, %v2328_v56 }
0x1578   :  { %v2329_v63 = vsub.f32 %v2319_v58, %v2327_v60 }
0x1579   :  { %v2332_v0 = vmul.f32 %v2330_v62, %v2330_v62 }
0x157a   :  { %v2331_v61 = vmul.f32 %v2329_v63, %v2329_v63 }
0x157b   :  { %v2336_v1 = vsel %vm92_vm0, %v2332_v0, 0.0 }
0x157c   :  { %2337 = vadd.xlane.f32.xlu1 %v2336_v1  ;;  %v2333_v2 = vsel %vm92_vm0, %v2331_v61, 0.0 }
0x157d   :  { %2334 = vadd.xlane.f32.xlu0 %v2333_v2 }
0x1609   :  { %v2338_v16 = vpop.xlane.xlu1 %2337 }
0x160a   :  { %v2340_v18 = vmul.f32 0.03125, %v2338_v16  ;;  %v2335_v8 = vpop.xlane.xlu0 %2334 }
0x160b   :  { %v2339_v19 = vmul.f32 0.03125, %v2335_v8 }
0x160c   :  { %v2342_v17 = vadd.f32 1e-05, %v2340_v18 }
0x160d   :  { %v2341_v20 = vadd.f32 1e-05, %v2339_v19 }
0x160e   :  { %3017 = vrsqrt.f32 %v2342_v17 }
0x160f   :  { %3019 = vrsqrt.f32 %v2341_v20 }
0x1618   :  { %v3018_v23 = vpop.eup %3017 }
0x1619   :  { %v3020_v25 = vpop.eup %3019  ;;  %v2346_v26 = vmul.f32 %v3018_v23, %v2330_v62 }
0x161a   :  { %v2345_v21 = vmul.f32 %v3020_v25, %v2329_v63 }
0x161b   :  { %v2352_v27 = vmul.f32 %v2350_v22, %v2346_v26 }
0x161c   :  { %v2351_v28 = vmul.f32 %v2350_v22, %v2345_v21 }
0x161d   :  { %v2358_v29 = vadd.f32 %v2356_v24, %v2352_v27 }
0x161e   :  { %v2357_v30 = vadd.f32 %v2356_v24, %v2351_v28 }
0x161f   :  { %v2360_v31 = vrot.slane %v2358_v29, 7 }
0x1621   :  { %v2363_v32 = vsel %vm2362_vm5, %v2357_v30, %v2360_v31 }
0x1622   :  { %2859 = vmatmul.mubr.msk.f32.vlgmr.msra.gmra.mrb[28].mxu1 %vm92_vm0, %v2363_v32 }
0x16f5   :  { %v2442_v34 = vpop.f32.mrb[28].mxu1 }
0x16f6   :  { %v2443_v10 = vadd.f32 %v2442_v34, %v2372_v33  ;;  %v2860_v35 = vpop.f32.mrb[29].mxu1 }
0x16f8   :  { %3021 = vtanh.f32 %v2443_v10 }
0x1702   :  { %v3022_v53 = vpop.eup %3021 }
0x1703   :  { %v2451_v36 = vmul.f32 %v3022_v53, %v2450_v42 }
0x1705   :  { %v2453_v37 = vsel %vm2452_vm6, %v2451_v36, 0.0 }
0x1706   :  { %2454 = vadd.xlane.f32.xlu1 %v2453_v37 }
0x1793   :  { %v2455_v43 = vpop.xlane.xlu1 %2454 }
0x1794   :  { %v2460_v44 = vadd.f32 %v2459_v39, %v2455_v43 }
0x1796   :  { %v2467_v45 = vand.u32 2147483647, %v2460_v44  ;;  %2462 = vst.msk [vmem:[%s3675_s10] sm:$0x3] %vm2461_vm7, %v2460_v44  ;;  %v2464_v40 = vmax.f32 %v2460_v44, 0.0  ;;  %v2465_v51 = vmul.f32 %v2463_v52, %v2460_v44  ;;  %s3136_s10 = smov [#allocation8]  }
0x1797   :  { %s2498_s12 = sshll.u32 %s3136_s10, 4  ;;  %s2499_s12 = int_to_ptr.vmem [resolvable:$true] %s2498_s12 }
0x1798   :  { %v2468_v11 = vsub.f32 0.0, %v2467_v45  ;;  %v2466_v49 = vsub.f32 %v2464_v40, %v2465_v51  ;;  %s3093_s14 = scalar_lea.vmem %s2499_s12, 16  ;;  %s3097_s15 = scalar_lea.vmem %s2499_s12, 32 }
0x1799   :  { %p3094_p10 = scmp.ne.s32.totalorder %s2499_s12, %s3093_s14  ;;  %p3098_p11 = scmp.lt.s32.totalorder %s2499_s12, %s2499_s12 }
0x179a   :  { %v2469_v46 = vmul.f32 1.442695, %v2468_v11  ;;  %p3099_p12 = scmp.lt.s32.totalorder %s3097_s15, %s3093_s14 }
0x179c   :  { %3023 = vpow2.f32 %v2469_v46  ;;  %p3100_p13 = por %p3099_p12, %p3098_p11 }
0x179e   :  { %p3101_p0 = pnand %p3100_p13, %p3094_p10 }
0x17a6   :  { %v3024_v38 = vpop.eup %3023 }
0x17a7   :  { %v2471_v47 = vadd.f32 1.0, %v3024_v38 }
0x17a9   :  { %3025 = vlog2.f32 %v2471_v47 }
0x17b3   :  { %v3026_v48 = vpop.eup %3025 }
0x17b4   :  { %v2473_v50 = vmul.f32 0.6931472, %v3026_v48 }
0x17b6   :  { %v2474_v12 = vadd.f32 %v2473_v50, %v2466_v49 }
0x17b8   :  { %v2475_v54 = vsel %vm2461_vm7, %v2474_v12, 0.0 }
0x17b9   :  { %2476 = vadd.xlane.f32.xlu0 %v2475_v54 }
0x1846   :  { %v2477_v55 = vpop.xlane.xlu0 %2476 }
0x1847   :  { %v2478_v58 = vrot.slane %v2477_v55, 4 }
0x1849   :  { %v2479_v57 = vadd.f32 %v2478_v58, %v2477_v55 }
0x184b   :  { %v2480_v7 = vrot.slane %v2479_v57, 2 }
0x184d   :  { %v2481_v5 = vadd.f32 %v2480_v7, %v2479_v57 }
0x184f   :  { %v2482_v56 = vrot.slane %v2481_v5, 1 }
0x1851   :  { %v2483_v59 = vadd.f32 %v2482_v56, %v2481_v5 }
0x1853   :  { %2947 = vpush %v2483_v59 }
0x1884   :  { %s2948_s2 = spop %2947 }
0x1885   :  { %v2485_v60 = vstv %s2948_s2 }
0x1886   :  { %v2487_v62 = vmul.f32 0.5, %v2485_v60 }
0x1888   :  { %2489 = vst.msk [vmem:[#allocation8] sm:$0x1] %vm2488_vm8, %v2487_v62 }
0x1889   :  { %3104 = shalt.err (!%p3101_p0)
}
0x188a   :  { %s3105_s0 = scalar_lea.hbm %s3676_s11, 16 }
0x188b   :  { %p3106_p1 = scmp.ne.s32.totalorder %s3676_s11, %s3105_s0  ;;  %p3109_p2 = scmp.lt.u32.totalorder %s3105_s0, %s3676_s11 }
0x188d   :  { %p3111_p3 = pnand %p3109_p2, %p3106_p1 }
0x188f   :  { %3114 = shalt.err (!%p3111_p3)
}
0x1890   :  { %2501 = dma.vmem_to_hbm [thread:$0]  %s2499_s12, 16, %s3676_s11, [#allocation4]  }
0x1891   :  { %3119 = dma.done.wait [#allocation4], 16  }
0x1892   :  { %3120 = vsyncadd [#allocation4], 4294967280 }
0x1893   :  { %2507 = vsyncpa [#allocation3], 1 }
0x1894   :  { %2508 = vsyncpa [#allocation6], 1 }
0x1895   :  { %2509 = vsyncpa [#allocation4], 1 }

</bundles_post_ra>
